<compile_context>
chip_gen: v7x
topology: tpu7x:2x2x1
jax: 0.10.0
libtpu: 0.0.40
codegen_flags: <defaults>
</compile_context>

<pallas_src>
import jax
import jax.numpy as jnp
from jax.experimental import pallas as pl
from jax.experimental.pallas import tpu as pltpu


# -----------------------------------------------------------------------------
# In-kernel helpers
# -----------------------------------------------------------------------------
def _mx(a, w):
    """2-D MXU matmul: bf16 operands, f32 accumulate."""
    return jnp.dot(a.astype(jnp.bfloat16), w.astype(jnp.bfloat16),
                   preferred_element_type=jnp.float32)


def _bmm(a, b):
    """Batched matmul [B,M,K]@[B,K,N] -> [B,M,N], bf16 operands, f32 accumulate."""
    return jax.lax.dot_general(
        a.astype(jnp.bfloat16), b.astype(jnp.bfloat16),
        dimension_numbers=(((2,), (1,)), ((0,), (0,))),
        preferred_element_type=jnp.float32)


def _softmax_last(x):
    m = jnp.max(x, axis=-1, keepdims=True)
    e = jnp.exp(x - m)
    return e * pl.reciprocal(jnp.sum(e, axis=-1, keepdims=True), approx=True)


# -----------------------------------------------------------------------------
# Pallas kernel: one full decoder step.
# Grid: (NV,) over vocab tiles ("arbitrary": output accumulates across the axis).
#   j == 0     : attention, selective read, embedding gather (DMA), DNN, combine,
#                GRU, copy attention; stash emb2/context in scratch, h_new in hid_ref.
#   every j    : logits for vocab tile j (streamed w_out slices) -> resident out_ref.
#   j == NV-1  : softmax over the resident logits + copy-distribution scatter.
# -----------------------------------------------------------------------------
def decoder_kernel(
    # inputs
    inp_smem_ref,     # [B]        int32  SMEM  previous token ids (gather indices)
    inp_ref,          # [B, 1]     int32  VMEM  previous token ids (vector compares)
    prehid_ref,       # [B, 2H]    f32
    enc_ref,          # [B, T, 2H] f32
    src_ref,          # [B, T]     int32
    emb_hbm_ref,      # [V, E]     f32    HBM (pl.ANY)
    w_align_enc_ref,  # [1, 2H]    f32
    w_align_h_ref,    # [1, 2H]    f32
    b_align_ref,      # [1, 1]     f32
    w_dnn_e_ref,      # [E, E]     bf16
    w_dnn_r_ref,      # [2H, E]    bf16
    b_dnn_ref,        # [1, E]     f32
    w_comb_e_ref,     # [E, E]     bf16
    w_comb_c_ref,     # [2H, E]    bf16
    b_comb_ref,       # [1, E]     f32
    w_ih_ref,         # [E, 3*2H]  bf16   fused GRU input weights (r,z,n)
    w_hh_ref,         # [2H, 3*2H] bf16
    b_ih_ref,         # [1, 3*2H]  f32
    b_hh_ref,         # [1, 3*2H]  f32
    w_copy_ref,       # [2H, 2H]   bf16
    b_copy_ref,       # [1, 2H]    f32
    w_out_e_ref,      # [E, TILE_V]  bf16  (vocab-tiled)
    w_out_c_ref,      # [2H, TILE_V] bf16
    w_out_h_ref,      # [2H, TILE_V] bf16
    b_out_ref,        # [1, TILE_V]  f32
    # outputs
    out_ref,          # [B, NV, TILE_V] f32   Gen_output + copy distribution
    hid_ref,          # [B, 2H] f32
    attn_ref,         # [B, T]  f32
    copyw_ref,        # [B, T]  f32
    # scratch
    emb_rows,         # VMEM [B, E]  f32   gathered embedding rows
    ctx_s,            # VMEM [B, 2H] f32
    emb2_s,           # VMEM [B, E]  f32
    dma_sem,          # DMA semaphores (B,)
):
    eps = 1e-8
    j = pl.program_id(0)
    nv = pl.num_programs(0)
    B, T, H2 = enc_ref.shape

    # -------------------------------------------------------------------------
    # Prologue (only once, at the first vocab tile).
    # -------------------------------------------------------------------------
    @pl.when(j == 0)
    def _prologue():
        enc = enc_ref[...]                           # [B, T, 2H] f32
        h_prev = prehid_ref[...]                     # [B, 2H]
        inp_col = inp_ref[...]                       # [B, 1] int32
        src = src_ref[...]                           # [B, T] int32

        # ---- embedding gather: DMA only the B needed rows HBM -> VMEM
        for b in range(B):
            row = inp_smem_ref[b]
            pltpu.make_async_copy(emb_hbm_ref.at[pl.ds(row, 1)],
                                  emb_rows.at[pl.ds(b, 1)],
                                  dma_sem.at[b]).start()
        for b in range(B):
            pltpu.make_async_copy(emb_hbm_ref.at[pl.ds(0, 1)],
                                  emb_rows.at[pl.ds(b, 1)],
                                  dma_sem.at[b]).wait()

        # ---- alignment attention (split weights -> no [B,T,4H] concat)
        scores = jnp.sum(enc * w_align_enc_ref[...][None, :, :], axis=-1)       # [B, T]
        scores = scores + jnp.sum(h_prev * w_align_h_ref[...], axis=-1,
                                  keepdims=True)                                # + [B, 1]
        scores = jnp.tanh(scores + b_align_ref[...])
        attn = _softmax_last(scores)                                            # [B, T]
        attn_ref[...] = attn

        # ---- selective-read weights
        mask = (src == inp_col).astype(jnp.float32)                             # [B, T]
        wsel = attn * mask
        denom = jnp.sum(wsel, axis=1, keepdims=True) + eps
        wsel = wsel * pl.reciprocal(denom, approx=True)

        # ---- fused context + selective read: one batched matmul over enc
        w2 = jnp.concatenate([attn[:, None, :], wsel[:, None, :]], axis=1)      # [B, 2, T]
        cr = _bmm(w2, enc)                                                      # [B, 2, 2H]
        context = cr[:, 0, :]                                                   # [B, 2H]
        readm = cr[:, 1, :]                                                     # [B, 2H]
        ctx_s[...] = context

        # ---- DNN on [embedding ; selective read] (split weights, no concat)
        emb = emb_rows[...]                                                     # [B, E]
        emb2 = _mx(emb, w_dnn_e_ref[...]) + _mx(readm, w_dnn_r_ref[...]) + b_dnn_ref[...]
        emb2_s[...] = emb2
        # TODO(synk): dropout (flag=True training path) omitted; this is the
        # deterministic flag=False / inference semantics.

        # ---- attention combine + ReLU -> GRU input
        x = _mx(emb2, w_comb_e_ref[...]) + _mx(context, w_comb_c_ref[...]) + b_comb_ref[...]
        x = jnp.maximum(x, 0.0)

        # ---- fused single-step GRU cell (PyTorch gate ordering r, z, n)
        gi = _mx(x, w_ih_ref[...]) + b_ih_ref[...]                              # [B, 3*2H]
        gh = _mx(h_prev, w_hh_ref[...]) + b_hh_ref[...]                         # [B, 3*2H]
        gi_r, gi_z, gi_n = gi[:, :H2], gi[:, H2:2 * H2], gi[:, 2 * H2:]
        gh_r, gh_z, gh_n = gh[:, :H2], gh[:, H2:2 * H2], gh[:, 2 * H2:]
        r = jax.nn.sigmoid(gi_r + gh_r)
        z = jax.nn.sigmoid(gi_z + gh_z)
        n = jnp.tanh(gi_n + r * gh_n)
        h_new = (1.0 - z) * n + z * h_prev                                      # [B, 2H]
        hid_ref[...] = h_new

        # ---- copy attention: sigmoid(enc @ Wc + bc) . h_new, softmax over T
        wc_b = jnp.broadcast_to(w_copy_ref[...][None], (B, H2, H2))
        ca = _bmm(enc, wc_b)                                                    # [B, T, 2H]
        ca = jax.nn.sigmoid(ca + b_copy_ref[...][None])
        cw = jnp.sum(ca * h_new[:, None, :], axis=-1)                           # [B, T]
        copyw_ref[...] = _softmax_last(cw)

    # -------------------------------------------------------------------------
    # Per vocab tile: logits for columns [j*TILE_V, (j+1)*TILE_V)
    # -------------------------------------------------------------------------
    emb2 = emb2_s[...]
    context = ctx_s[...]
    h_new = hid_ref[...]
    logits = (_mx(emb2, w_out_e_ref[...]) + _mx(context, w_out_c_ref[...])
              + _mx(h_new, w_out_h_ref[...]) + b_out_ref[...])                  # [B, TILE_V]
    out_ref[:, pl.ds(j, 1), :] = logits[:, None, :]

    # -------------------------------------------------------------------------
    # Finalize: softmax over the resident logits + copy-distribution scatter.
    # -------------------------------------------------------------------------
    @pl.when(j == nv - 1)
    def _finalize():
        raw = out_ref[...]                                                      # [B, NV, TV]
        NV_, TV = raw.shape[1], raw.shape[2]
        m = jnp.max(jnp.max(raw, axis=-1, keepdims=True), axis=-2, keepdims=True)
        e = jnp.exp(raw - m)
        l = jnp.sum(jnp.sum(e, axis=-1, keepdims=True), axis=-2, keepdims=True)
        out_ref[...] = e * pl.reciprocal(l, approx=True)

        attn = attn_ref[...]                                                    # [B, T]
        src_f = src_ref[...].astype(jnp.float32)                                # [B, T]
        lane_t = jax.lax.broadcasted_iota(jnp.int32, (B, T), 1)
        gid = (jax.lax.broadcasted_iota(jnp.int32, (B, NV_, TV), 1) * TV
               + jax.lax.broadcasted_iota(jnp.int32, (B, NV_, TV), 2)
               ).astype(jnp.float32)

        # scatter attention mass onto source token ids without a [B,T,V] one-hot
        @pl.loop(0, T)
        def _scatter(t):
            sel = lane_t == t
            a_t = jnp.sum(jnp.where(sel, attn, 0.0), axis=1, keepdims=True)     # [B, 1]
            s_t = jnp.sum(jnp.where(sel, src_f, 0.0), axis=1, keepdims=True)    # [B, 1]
            hit = (gid == s_t[:, :, None]).astype(jnp.float32)                  # [B, NV, TV]
            out_ref[...] = out_ref[...] + a_t[:, :, None] * hit


# -----------------------------------------------------------------------------
# Host-side weight layout: split / fuse / cast to bf16 (MXU operands).
# -----------------------------------------------------------------------------
def _prepare_kernel_params(p, E, H2):
    bf = lambda x: x.astype(jnp.bfloat16)
    w_align, w_out = p["w_align"], p["w_out"]
    w_ih, w_hh, b_ih, b_hh = p["w_ih"], p["w_hh"], p["b_ih"], p["b_hh"]
    return dict(
        w_align_enc=w_align[:, :H2], w_align_h=w_align[:, H2:], b_align=p["b_align"],
        w_dnn_e=bf(p["w_dnn"][:E]), w_dnn_r=bf(p["w_dnn"][E:]), b_dnn=p["b_dnn"],
        w_comb_e=bf(p["w_comb"][:E]), w_comb_c=bf(p["w_comb"][E:]), b_comb=p["b_comb"],
        w_ih=bf(jnp.concatenate([w_ih[0], w_ih[1], w_ih[2]], axis=1)),
        w_hh=bf(jnp.concatenate([w_hh[0], w_hh[1], w_hh[2]], axis=1)),
        b_ih=jnp.concatenate([b_ih[0], b_ih[1], b_ih[2]], axis=1),
        b_hh=jnp.concatenate([b_hh[0], b_hh[1], b_hh[2]], axis=1),
        w_copy=bf(p["w_copy"]), b_copy=p["b_copy"],
        w_out_e=bf(w_out[:E]), w_out_c=bf(w_out[E:E + H2]), w_out_h=bf(w_out[E + H2:]),
        b_out=p["b_out"],
        emb=p["emb"],
    )


def _pick_tile_v(V):
    for t in (2048, 1024, 512, 256, 128):
        if V % t == 0:
            return t
    return V


def _full(x):
    nd = x.ndim
    return pl.BlockSpec(x.shape, lambda *_: (0,) * nd)


# -----------------------------------------------------------------------------
# Wrapper (mirrors AttentionCopyDecoder.forward, flag=False)
# -----------------------------------------------------------------------------
def attention_copy_decoder(params, input_ids, pre_hidden, encoder_outputs, source_input):
    """
    input_ids:        [B, 1]      int32
    pre_hidden:       [B, 1, 2H]  f32
    encoder_outputs:  [B, T, 2H]  f32
    source_input:     [B, T]      int32
    Returns (output [B,V], current_hidden [B,1,2H],
             attention_weights [B,1,T], copy_attention_weights [B,T]).
    """
    B, T, H2 = encoder_outputs.shape
    E = params["w_dnn"].shape[1]
    V = params["w_out"].shape[1]
    pre_h2 = pre_hidden.reshape(B, H2)

    TILE_V = _pick_tile_v(V)
    NV = V // TILE_V

    kp = _prepare_kernel_params(params, E, H2)

    inp_smem = input_ids.reshape(B).astype(jnp.int32)
    inp_vmem = input_ids.astype(jnp.int32)
    src = source_input.astype(jnp.int32)

    args = (
        inp_smem, inp_vmem, pre_h2, encoder_outputs, src,
        kp["emb"],
        kp["w_align_enc"], kp["w_align_h"], kp["b_align"],
        kp["w_dnn_e"], kp["w_dnn_r"], kp["b_dnn"],
        kp["w_comb_e"], kp["w_comb_c"], kp["b_comb"],
        kp["w_ih"], kp["w_hh"], kp["b_ih"], kp["b_hh"],
        kp["w_copy"], kp["b_copy"],
        kp["w_out_e"], kp["w_out_c"], kp["w_out_h"], kp["b_out"],
    )

    vtile = lambda rows: pl.BlockSpec((rows, TILE_V), lambda j: (0, j))
    in_specs = [
        pl.BlockSpec(memory_space=pltpu.MemorySpace.SMEM),   # inp ids (scalars)
        _full(inp_vmem), _full(pre_h2), _full(encoder_outputs), _full(src),
        pl.BlockSpec(memory_space=pl.ANY),                   # embedding table in HBM
        _full(kp["w_align_enc"]), _full(kp["w_align_h"]), _full(kp["b_align"]),
        _full(kp["w_dnn_e"]), _full(kp["w_dnn_r"]), _full(kp["b_dnn"]),
        _full(kp["w_comb_e"]), _full(kp["w_comb_c"]), _full(kp["b_comb"]),
        _full(kp["w_ih"]), _full(kp["w_hh"]), _full(kp["b_ih"]), _full(kp["b_hh"]),
        _full(kp["w_copy"]), _full(kp["b_copy"]),
        vtile(E), vtile(H2), vtile(H2), vtile(1),
    ]

    out_shapes = (
        jax.ShapeDtypeStruct((B, NV, TILE_V), jnp.float32),
        jax.ShapeDtypeStruct((B, H2), jnp.float32),
        jax.ShapeDtypeStruct((B, T), jnp.float32),
        jax.ShapeDtypeStruct((B, T), jnp.float32),
    )
    out_specs = (
        pl.BlockSpec((B, NV, TILE_V), lambda j: (0, 0, 0)),
        pl.BlockSpec((B, H2), lambda j: (0, 0)),
        pl.BlockSpec((B, T), lambda j: (0, 0)),
        pl.BlockSpec((B, T), lambda j: (0, 0)),
    )
    scratch_shapes = [
        pltpu.VMEM((B, E), jnp.float32),    # gathered embedding rows
        pltpu.VMEM((B, H2), jnp.float32),   # context
        pltpu.VMEM((B, E), jnp.float32),    # emb2
        pltpu.SemaphoreType.DMA((B,)),
    ]

    out3, h_new, attn, copy_w = pl.pallas_call(
        decoder_kernel,
        out_shape=out_shapes,
        grid=(NV,),
        in_specs=in_specs,
        out_specs=out_specs,
        scratch_shapes=scratch_shapes,
        compiler_params=pltpu.CompilerParams(
            dimension_semantics=("arbitrary",),
            vmem_limit_bytes=32 * 1024 * 1024,
        ),
    )(*args)

    return (out3.reshape(B, V), h_new.reshape(B, 1, H2),
            attn.reshape(B, 1, T), copy_w)


# -----------------------------------------------------------------------------
# Pure-JAX reference (mirrors the PyTorch forward, flag=False), full f32.
# -----------------------------------------------------------------------------
def reference_forward(p, input_ids, pre_hidden, enc, src, eps=1e-8):
    with jax.default_matmul_precision("highest"):
        B, T, H2 = enc.shape
        V, E = p["emb"].shape
        h_prev = pre_hidden.reshape(B, H2)

        cat = jnp.concatenate([enc, jnp.repeat(pre_hidden, T, axis=1)], axis=2)
        aw = jnp.tanh(jnp.einsum("btk,ok->bto", cat, p["w_align"])
                      + p["b_align"].reshape(1, 1, 1))
        aw = jax.nn.softmax(aw, axis=1)[:, :, 0]                                  # [B,T]

        context = jnp.einsum("bt,btk->bk", aw, enc)
        emb = p["emb"][input_ids[:, 0]]

        mask = (src == input_ids).astype(jnp.float32)
        w = aw * mask
        readm = jnp.einsum("bt,btk->bk",
                           w / (jnp.sum(w, axis=1, keepdims=True) + eps), enc)

        emb2 = jnp.concatenate([emb, readm], axis=-1) @ p["w_dnn"] + p["b_dnn"]
        x = jnp.concatenate([emb2, context], axis=-1) @ p["w_comb"] + p["b_comb"]
        x = jax.nn.relu(x)

        gi_r = x @ p["w_ih"][0] + p["b_ih"][0]
        gi_z = x @ p["w_ih"][1] + p["b_ih"][1]
        gi_n = x @ p["w_ih"][2] + p["b_ih"][2]
        gh_r = h_prev @ p["w_hh"][0] + p["b_hh"][0]
        gh_z = h_prev @ p["w_hh"][1] + p["b_hh"][1]
        gh_n = h_prev @ p["w_hh"][2] + p["b_hh"][2]
        r = jax.nn.sigmoid(gi_r + gh_r)
        z = jax.nn.sigmoid(gi_z + gh_z)
        n = jnp.tanh(gi_n + r * gh_n)
        h_new = (1.0 - z) * n + z * h_prev

        logits = jnp.concatenate([emb2, context, h_new], axis=-1) @ p["w_out"] + p["b_out"]
        gen = jax.nn.softmax(logits, axis=1)

        ca = jax.nn.sigmoid(jnp.einsum("btk,kj->btj", enc, p["w_copy"]) + p["b_copy"][None])
        copy_w = jax.nn.softmax(jnp.einsum("btj,bj->bt", ca, h_new), axis=1)

        onehot_src = jax.nn.one_hot(src, V, dtype=jnp.float32)
        spp = jnp.einsum("bt,btv->bv", aw, onehot_src)

        return gen + spp, h_new.reshape(B, 1, H2), aw.reshape(B, 1, T), copy_w


# -----------------------------------------------------------------------------
def init_params(key, embedding_size, hidden_size, output_size, vocab_size):
    E, H, V = embedding_size, hidden_size, output_size
    H2 = 2 * H
    ks = jax.random.split(key, 16)
    s = 0.1

    def nrm(k, shape):
        return (s * jax.random.normal(k, shape)).astype(jnp.float32)

    return {
        "emb":     nrm(ks[0], (vocab_size, E)),
        "w_align": nrm(ks[1], (1, 2 * H2)),       # Linear(4H, 1) weight [1, 4H]
        "b_align": nrm(ks[2], (1, 1)),
        "w_dnn":   nrm(ks[3], (E + H2, E)),
        "b_dnn":   nrm(ks[4], (1, E)),
        "w_ih":    nrm(ks[5], (3, E, H2)),        # GRU (r, z, n) input weights
        "w_hh":    nrm(ks[6], (3, H2, H2)),
        "b_ih":    nrm(ks[7], (3, 1, H2)),
        "b_hh":    nrm(ks[8], (3, 1, H2)),
        "w_comb":  nrm(ks[9], (H2 + E, E)),
        "b_comb":  nrm(ks[10], (1, E)),
        "w_out":   nrm(ks[11], (2 * H2 + E, V)),
        "b_out":   nrm(ks[12], (1, V)),
        "w_copy":  nrm(ks[13], (H2, H2)),
        "b_copy":  nrm(ks[14], (1, H2)),
    }


if __name__ == "__main__":
    B, T, E, H = 2, 8, 32, 16          # batch, max_time_steps, embedding, hidden
    V = 128                            # output_size == vocab size
    H2 = 2 * H

    key = jax.random.PRNGKey(0)
    kparam, k1, k2, k3 = jax.random.split(key, 4)

    params = init_params(kparam, E, H, V, V)

    source_input = jax.random.randint(k1, (B, T), 0, V, dtype=jnp.int32)
    input_ids = source_input[:, :1]                     # previous token (present in source)
    pre_hidden = (0.1 * jax.random.normal(k2, (B, 1, H2))).astype(jnp.float32)
    encoder_outputs = (0.1 * jax.random.normal(k3, (B, T, H2))).astype(jnp.float32)

    out, h_new, attn, copy_w = attention_copy_decoder(
        params, input_ids, pre_hidden, encoder_outputs, source_input)
    jax.block_until_ready((out, h_new, attn, copy_w))

    r_out, r_h, r_attn, r_copy = reference_forward(
        params, input_ids, pre_hidden, encoder_outputs, source_input)

    rtol, atol = 1e-2, 5e-3   # kernel uses bf16 MXU operands vs. f32 reference
    assert jnp.allclose(out, r_out, rtol=rtol, atol=atol), "output mismatch"
    assert jnp.allclose(h_new, r_h, rtol=rtol, atol=atol), "hidden mismatch"
    assert jnp.allclose(attn, r_attn, rtol=rtol, atol=atol), "attention mismatch"
    assert jnp.allclose(copy_w, r_copy, rtol=rtol, atol=atol), "copy attention mismatch"

    print("KERNEL_OK")
</pallas_src>

<mosaic_0001>
module attributes {stable_mosaic.version = 11 : i64} {
  func.func @decoder_kernel(%arg0: i32, %arg1: memref<2xi32, #tpu.memory_space<smem>>, %arg2: memref<2x1xi32, #tpu.memory_space<vmem>>, %arg3: memref<2x32xf32, #tpu.memory_space<vmem>>, %arg4: memref<2x8x32xf32, #tpu.memory_space<vmem>>, %arg5: memref<2x8xi32, #tpu.memory_space<vmem>>, %arg6: memref<128x32xf32, #tpu.memory_space<any>>, %arg7: memref<1x32xf32, #tpu.memory_space<vmem>>, %arg8: memref<1x32xf32, #tpu.memory_space<vmem>>, %arg9: memref<1x1xf32, #tpu.memory_space<vmem>>, %arg10: memref<32x32xbf16, #tpu.memory_space<vmem>>, %arg11: memref<32x32xbf16, #tpu.memory_space<vmem>>, %arg12: memref<1x32xf32, #tpu.memory_space<vmem>>, %arg13: memref<32x32xbf16, #tpu.memory_space<vmem>>, %arg14: memref<32x32xbf16, #tpu.memory_space<vmem>>, %arg15: memref<1x32xf32, #tpu.memory_space<vmem>>, %arg16: memref<32x96xbf16, #tpu.memory_space<vmem>>, %arg17: memref<32x96xbf16, #tpu.memory_space<vmem>>, %arg18: memref<1x96xf32, #tpu.memory_space<vmem>>, %arg19: memref<1x96xf32, #tpu.memory_space<vmem>>, %arg20: memref<32x32xbf16, #tpu.memory_space<vmem>>, %arg21: memref<1x32xf32, #tpu.memory_space<vmem>>, %arg22: memref<32x128xbf16, #tpu.memory_space<vmem>>, %arg23: memref<32x128xbf16, #tpu.memory_space<vmem>>, %arg24: memref<32x128xbf16, #tpu.memory_space<vmem>>, %arg25: memref<1x128xf32, #tpu.memory_space<vmem>>, %arg26: memref<2x1x128xf32, #tpu.memory_space<vmem>>, %arg27: memref<2x32xf32, #tpu.memory_space<vmem>>, %arg28: memref<2x8xf32, #tpu.memory_space<vmem>>, %arg29: memref<2x8xf32, #tpu.memory_space<vmem>>, %arg30: memref<2x32xf32, #tpu.memory_space<vmem>>, %arg31: memref<2x32xf32, #tpu.memory_space<vmem>>, %arg32: memref<2x32xf32, #tpu.memory_space<vmem>>, %arg33: memref<2x!tpu.dma_semaphore, #tpu.memory_space<semaphore_mem>>) attributes {dimension_semantics = [#tpu.dimension_semantics<arbitrary>], iteration_bounds = array<i64: 1>, scalar_prefetch = 0 : i64, scratch_operands = 4 : i64, tpu.core_type = #tpu.core_type<tc>, window_params = [{transform_indices = @transform_0, window_bounds = array<i64: 2>}, {pipeline_mode = #tpu.pipeline_mode<synchronous>, transform_indices = @transform_1, window_bounds = array<i64: 2, 1>}, {pipeline_mode = #tpu.pipeline_mode<synchronous>, transform_indices = @transform_2, window_bounds = array<i64: 2, 32>}, {pipeline_mode = #tpu.pipeline_mode<synchronous>, transform_indices = @transform_3, window_bounds = array<i64: 2, 8, 32>}, {pipeline_mode = #tpu.pipeline_mode<synchronous>, transform_indices = @transform_4, window_bounds = array<i64: 2, 8>}, {}, {pipeline_mode = #tpu.pipeline_mode<synchronous>, transform_indices = @transform_6, window_bounds = array<i64: 1, 32>}, {pipeline_mode = #tpu.pipeline_mode<synchronous>, transform_indices = @transform_7, window_bounds = array<i64: 1, 32>}, {pipeline_mode = #tpu.pipeline_mode<synchronous>, transform_indices = @transform_8, window_bounds = array<i64: 1, 1>}, {pipeline_mode = #tpu.pipeline_mode<synchronous>, transform_indices = @transform_9, window_bounds = array<i64: 32, 32>}, {pipeline_mode = #tpu.pipeline_mode<synchronous>, transform_indices = @transform_10, window_bounds = array<i64: 32, 32>}, {pipeline_mode = #tpu.pipeline_mode<synchronous>, transform_indices = @transform_11, window_bounds = array<i64: 1, 32>}, {pipeline_mode = #tpu.pipeline_mode<synchronous>, transform_indices = @transform_12, window_bounds = array<i64: 32, 32>}, {pipeline_mode = #tpu.pipeline_mode<synchronous>, transform_indices = @transform_13, window_bounds = array<i64: 32, 32>}, {pipeline_mode = #tpu.pipeline_mode<synchronous>, transform_indices = @transform_14, window_bounds = array<i64: 1, 32>}, {pipeline_mode = #tpu.pipeline_mode<synchronous>, transform_indices = @transform_15, window_bounds = array<i64: 32, 96>}, {pipeline_mode = #tpu.pipeline_mode<synchronous>, transform_indices = @transform_16, window_bounds = array<i64: 32, 96>}, {pipeline_mode = #tpu.pipeline_mode<synchronous>, transform_indices = @transform_17, window_bounds = array<i64: 1, 96>}, {pipeline_mode = #tpu.pipeline_mode<synchronous>, transform_indices = @transform_18, window_bounds = array<i64: 1, 96>}, {pipeline_mode = #tpu.pipeline_mode<synchronous>, transform_indices = @transform_19, window_bounds = array<i64: 32, 32>}, {pipeline_mode = #tpu.pipeline_mode<synchronous>, transform_indices = @transform_20, window_bounds = array<i64: 1, 32>}, {transform_indices = @transform_21, window_bounds = array<i64: 32, 128>}, {transform_indices = @transform_22, window_bounds = array<i64: 32, 128>}, {transform_indices = @transform_23, window_bounds = array<i64: 32, 128>}, {transform_indices = @transform_24, window_bounds = array<i64: 1, 128>}, {pipeline_mode = #tpu.pipeline_mode<synchronous>, transform_indices = @transform_25, window_bounds = array<i64: 2, 1, 128>}, {pipeline_mode = #tpu.pipeline_mode<synchronous>, transform_indices = @transform_26, window_bounds = array<i64: 2, 32>}, {pipeline_mode = #tpu.pipeline_mode<synchronous>, transform_indices = @transform_27, window_bounds = array<i64: 2, 8>}, {pipeline_mode = #tpu.pipeline_mode<synchronous>, transform_indices = @transform_28, window_bounds = array<i64: 2, 8>}]} {
    %c0_i32 = arith.constant 0 : i32
    %0 = arith.cmpi eq, %arg0, %c0_i32 : i32
    %1 = arith.extui %0 : i1 to i32
    %c0_i32_0 = arith.constant 0 : i32
    %2 = arith.cmpi ne, %1, %c0_i32_0 : i32
    scf.if %2 {
      %c0_20 = arith.constant 0 : index
      %c0_21 = arith.constant 0 : index
      %c0_22 = arith.constant 0 : index
      %26 = vector.load %arg4[%c0_20, %c0_21, %c0_22] : memref<2x8x32xf32, #tpu.memory_space<vmem>>, vector<2x8x32xf32>
      %c0_23 = arith.constant 0 : index
      %c0_24 = arith.constant 0 : index
      %27 = vector.load %arg3[%c0_23, %c0_24] : memref<2x32xf32, #tpu.memory_space<vmem>>, vector<2x32xf32>
      %c0_25 = arith.constant 0 : index
      %c0_26 = arith.constant 0 : index
      %28 = vector.load %arg2[%c0_25, %c0_26] : memref<2x1xi32, #tpu.memory_space<vmem>>, vector<2x1xi32>
      %c0_27 = arith.constant 0 : index
      %c0_28 = arith.constant 0 : index
      %29 = vector.load %arg5[%c0_27, %c0_28] : memref<2x8xi32, #tpu.memory_space<vmem>>, vector<2x8xi32>
      %c0_29 = arith.constant 0 : index
      %30 = memref.load %arg1[%c0_29] : memref<2xi32, #tpu.memory_space<smem>>
      %c0_i32_30 = arith.constant 0 : i32
      %c0_i32_31 = arith.constant 0 : i32
      %31 = tpu.memref_slice %arg6[%30, %c0_i32_31] : memref<128x32xf32, #tpu.memory_space<any>> -> memref<1x32xf32, #tpu.memory_space<any>>
      %c0_i32_32 = arith.constant 0 : i32
      %c0_i32_33 = arith.constant 0 : i32
      %32 = tpu.memref_slice %arg30[%c0_i32_32, %c0_i32_33] : memref<2x32xf32, #tpu.memory_space<vmem>> -> memref<1x32xf32, #tpu.memory_space<vmem>>
      %33 = tpu.memref_slice %arg33[%c0_i32_30] : memref<2x!tpu.dma_semaphore, #tpu.memory_space<semaphore_mem>> -> memref<1x!tpu.dma_semaphore, #tpu.memory_space<semaphore_mem>>
      %34 = tpu.memref_squeeze %33 : memref<1x!tpu.dma_semaphore, #tpu.memory_space<semaphore_mem>> -> memref<!tpu.dma_semaphore, #tpu.memory_space<semaphore_mem>>
      tpu.enqueue_dma source(%31 : memref<1x32xf32, #tpu.memory_space<any>>) target(%32 : memref<1x32xf32, #tpu.memory_space<vmem>>) target_semaphore(%34 : memref<!tpu.dma_semaphore, #tpu.memory_space<semaphore_mem>>)
      %c1 = arith.constant 1 : index
      %35 = memref.load %arg1[%c1] : memref<2xi32, #tpu.memory_space<smem>>
      %c1_i32 = arith.constant 1 : i32
      %c0_i32_34 = arith.constant 0 : i32
      %36 = tpu.memref_slice %arg6[%35, %c0_i32_34] : memref<128x32xf32, #tpu.memory_space<any>> -> memref<1x32xf32, #tpu.memory_space<any>>
      %c1_i32_35 = arith.constant 1 : i32
      %c0_i32_36 = arith.constant 0 : i32
      %37 = tpu.memref_slice %arg30[%c1_i32_35, %c0_i32_36] : memref<2x32xf32, #tpu.memory_space<vmem>> -> memref<1x32xf32, #tpu.memory_space<vmem>>
      %38 = tpu.memref_slice %arg33[%c1_i32] : memref<2x!tpu.dma_semaphore, #tpu.memory_space<semaphore_mem>> -> memref<1x!tpu.dma_semaphore, #tpu.memory_space<semaphore_mem>>
      %39 = tpu.memref_squeeze %38 : memref<1x!tpu.dma_semaphore, #tpu.memory_space<semaphore_mem>> -> memref<!tpu.dma_semaphore, #tpu.memory_space<semaphore_mem>>
      tpu.enqueue_dma source(%36 : memref<1x32xf32, #tpu.memory_space<any>>) target(%37 : memref<1x32xf32, #tpu.memory_space<vmem>>) target_semaphore(%39 : memref<!tpu.dma_semaphore, #tpu.memory_space<semaphore_mem>>)
      %c0_i32_37 = arith.constant 0 : i32
      %c0_i32_38 = arith.constant 0 : i32
      %c0_i32_39 = arith.constant 0 : i32
      %40 = tpu.memref_slice %arg6[%c0_i32_38, %c0_i32_39] : memref<128x32xf32, #tpu.memory_space<any>> -> memref<1x32xf32, #tpu.memory_space<any>>
      %c0_i32_40 = arith.constant 0 : i32
      %c0_i32_41 = arith.constant 0 : i32
      %41 = tpu.memref_slice %arg30[%c0_i32_40, %c0_i32_41] : memref<2x32xf32, #tpu.memory_space<vmem>> -> memref<1x32xf32, #tpu.memory_space<vmem>>
      %42 = tpu.memref_slice %arg33[%c0_i32_37] : memref<2x!tpu.dma_semaphore, #tpu.memory_space<semaphore_mem>> -> memref<1x!tpu.dma_semaphore, #tpu.memory_space<semaphore_mem>>
      %43 = tpu.memref_squeeze %42 : memref<1x!tpu.dma_semaphore, #tpu.memory_space<semaphore_mem>> -> memref<!tpu.dma_semaphore, #tpu.memory_space<semaphore_mem>>
      tpu.wait_dma2 semaphore(%43 : memref<!tpu.dma_semaphore, #tpu.memory_space<semaphore_mem>>) src(%40 : memref<1x32xf32, #tpu.memory_space<any>>) dst(%41 : memref<1x32xf32, #tpu.memory_space<vmem>>)
      %c1_i32_42 = arith.constant 1 : i32
      %c0_i32_43 = arith.constant 0 : i32
      %c0_i32_44 = arith.constant 0 : i32
      %44 = tpu.memref_slice %arg6[%c0_i32_43, %c0_i32_44] : memref<128x32xf32, #tpu.memory_space<any>> -> memref<1x32xf32, #tpu.memory_space<any>>
      %c1_i32_45 = arith.constant 1 : i32
      %c0_i32_46 = arith.constant 0 : i32
      %45 = tpu.memref_slice %arg30[%c1_i32_45, %c0_i32_46] : memref<2x32xf32, #tpu.memory_space<vmem>> -> memref<1x32xf32, #tpu.memory_space<vmem>>
      %46 = tpu.memref_slice %arg33[%c1_i32_42] : memref<2x!tpu.dma_semaphore, #tpu.memory_space<semaphore_mem>> -> memref<1x!tpu.dma_semaphore, #tpu.memory_space<semaphore_mem>>
      %47 = tpu.memref_squeeze %46 : memref<1x!tpu.dma_semaphore, #tpu.memory_space<semaphore_mem>> -> memref<!tpu.dma_semaphore, #tpu.memory_space<semaphore_mem>>
      tpu.wait_dma2 semaphore(%47 : memref<!tpu.dma_semaphore, #tpu.memory_space<semaphore_mem>>) src(%44 : memref<1x32xf32, #tpu.memory_space<any>>) dst(%45 : memref<1x32xf32, #tpu.memory_space<vmem>>)
      %c0_47 = arith.constant 0 : index
      %c0_48 = arith.constant 0 : index
      %48 = vector.load %arg7[%c0_47, %c0_48] : memref<1x32xf32, #tpu.memory_space<vmem>>, vector<1x32xf32>
      %49 = vector.shape_cast %48 : vector<1x32xf32> to vector<1x1x32xf32>
      %50 = vector.broadcast %49 : vector<1x1x32xf32> to vector<2x8x32xf32>
      %51 = arith.mulf %26, %50 : vector<2x8x32xf32>
      %cst_49 = arith.constant dense<0.000000e+00> : vector<2x8xf32>
      %52 = vector.multi_reduction <add>, %51, %cst_49 [2] : vector<2x8x32xf32> to vector<2x8xf32>
      %c0_50 = arith.constant 0 : index
      %c0_51 = arith.constant 0 : index
      %53 = vector.load %arg8[%c0_50, %c0_51] : memref<1x32xf32, #tpu.memory_space<vmem>>, vector<1x32xf32>
      %54 = vector.broadcast %53 : vector<1x32xf32> to vector<2x32xf32>
      %55 = arith.mulf %27, %54 : vector<2x32xf32>
      %cst_52 = arith.constant dense<0.000000e+00> : vector<2xf32>
      %56 = vector.multi_reduction <add>, %55, %cst_52 [1] : vector<2x32xf32> to vector<2xf32>
      %57 = vector.shape_cast %56 : vector<2xf32> to vector<2x1xf32>
      %58 = vector.broadcast %57 : vector<2x1xf32> to vector<2x8xf32>
      %59 = arith.addf %52, %58 : vector<2x8xf32>
      %c0_53 = arith.constant 0 : index
      %c0_54 = arith.constant 0 : index
      %60 = vector.load %arg9[%c0_53, %c0_54] : memref<1x1xf32, #tpu.memory_space<vmem>>, vector<1x1xf32>
      %61 = vector.broadcast %60 : vector<1x1xf32> to vector<2x8xf32>
      %62 = arith.addf %59, %61 : vector<2x8xf32>
      %63 = math.tanh %62 : vector<2x8xf32>
      %cst_55 = arith.constant dense<0xFF800000> : vector<2xf32>
      %64 = vector.multi_reduction <maximumf>, %63, %cst_55 [1] : vector<2x8xf32> to vector<2xf32>
      %65 = vector.shape_cast %64 : vector<2xf32> to vector<2x1xf32>
      %66 = vector.broadcast %65 : vector<2x1xf32> to vector<2x8xf32>
      %67 = arith.subf %63, %66 : vector<2x8xf32>
      %68 = math.exp %67 : vector<2x8xf32>
      %cst_56 = arith.constant dense<0.000000e+00> : vector<2xf32>
      %69 = vector.multi_reduction <add>, %68, %cst_56 [1] : vector<2x8xf32> to vector<2xf32>
      %70 = vector.shape_cast %69 : vector<2xf32> to vector<2x1xf32>
      %71 = tpu.reciprocal %70 {approx = true} : vector<2x1xf32> -> vector<2x1xf32>
      %72 = vector.broadcast %71 : vector<2x1xf32> to vector<2x8xf32>
      %73 = arith.mulf %68, %72 : vector<2x8xf32>
      %c0_57 = arith.constant 0 : index
      %c0_58 = arith.constant 0 : index
      %74 = vector.load %arg28[%c0_57, %c0_58] : memref<2x8xf32, #tpu.memory_space<vmem>>, vector<2x8xf32>
      tpu.vector_store %arg28[%c0_57, %c0_58], %73 {strides = array<i32>} : memref<2x8xf32, #tpu.memory_space<vmem>>, vector<2x8xf32>,
      %75 = vector.broadcast %28 : vector<2x1xi32> to vector<2x8xi32>
      %76 = arith.cmpi eq, %29, %75 : vector<2x8xi32>
      %77 = arith.extui %76 : vector<2x8xi1> to vector<2x8xi32>
      %78 = arith.sitofp %77 : vector<2x8xi32> to vector<2x8xf32>
      %79 = arith.mulf %73, %78 : vector<2x8xf32>
      %cst_59 = arith.constant dense<0.000000e+00> : vector<2xf32>
      %80 = vector.multi_reduction <add>, %79, %cst_59 [1] : vector<2x8xf32> to vector<2xf32>
      %81 = vector.shape_cast %80 : vector<2xf32> to vector<2x1xf32>
      %cst_60 = arith.constant 9.99999993E-9 : f32
      %82 = vector.broadcast %cst_60 : f32 to vector<2x1xf32>
      %83 = arith.addf %81, %82 : vector<2x1xf32>
      %84 = tpu.reciprocal %83 {approx = true} : vector<2x1xf32> -> vector<2x1xf32>
      %85 = vector.broadcast %84 : vector<2x1xf32> to vector<2x8xf32>
      %86 = arith.mulf %79, %85 : vector<2x8xf32>
      %87 = vector.shape_cast %73 : vector<2x8xf32> to vector<2x1x8xf32>
      %88 = vector.shape_cast %86 : vector<2x8xf32> to vector<2x1x8xf32>
      %89 = tpu.concatenate %87, %88 in 1 : vector<2x1x8xf32>, vector<2x1x8xf32> -> vector<2x2x8xf32>
      %90 = arith.truncf %89 : vector<2x2x8xf32> to vector<2x2x8xbf16>
      %91 = arith.truncf %26 : vector<2x8x32xf32> to vector<2x8x32xbf16>
      %cst_61 = arith.constant dense<0.000000e+00> : vector<2x2x32xf32>
      %92 = tpu.matmul %90, %91, %cst_61 {dimension_numbers = #tpu.dot_dimension_numbers<[2], [1], [1], [2], [0, 0, 0, 1, 1, 2], [0], [0]>} : vector<2x2x8xbf16>, vector<2x8x32xbf16>, vector<2x2x32xf32> -> vector<2x2x32xf32>
      %93 = vector.extract_strided_slice %92 {offsets = [0, 0, 0], sizes = [2, 1, 32], strides = [1, 1, 1]} : vector<2x2x32xf32> to vector<2x1x32xf32>
      %94 = vector.shape_cast %93 : vector<2x1x32xf32> to vector<2x32xf32>
      %95 = vector.extract_strided_slice %92 {offsets = [0, 1, 0], sizes = [2, 1, 32], strides = [1, 1, 1]} : vector<2x2x32xf32> to vector<2x1x32xf32>
      %96 = vector.shape_cast %95 : vector<2x1x32xf32> to vector<2x32xf32>
      %c0_62 = arith.constant 0 : index
      %c0_63 = arith.constant 0 : index
      %97 = vector.load %arg31[%c0_62, %c0_63] : memref<2x32xf32, #tpu.memory_space<vmem>>, vector<2x32xf32>
      tpu.vector_store %arg31[%c0_62, %c0_63], %94 {strides = array<i32>} : memref<2x32xf32, #tpu.memory_space<vmem>>, vector<2x32xf32>,
      %c0_64 = arith.constant 0 : index
      %c0_65 = arith.constant 0 : index
      %98 = vector.load %arg30[%c0_64, %c0_65] : memref<2x32xf32, #tpu.memory_space<vmem>>, vector<2x32xf32>
      %c0_66 = arith.constant 0 : index
      %c0_67 = arith.constant 0 : index
      %99 = vector.load %arg10[%c0_66, %c0_67] : memref<32x32xbf16, #tpu.memory_space<vmem>>, vector<32x32xbf16>
      %100 = arith.truncf %98 : vector<2x32xf32> to vector<2x32xbf16>
      %cst_68 = arith.constant dense<0.000000e+00> : vector<2x32xf32>
      %101 = tpu.matmul %100, %99, %cst_68 {dimension_numbers = #tpu.dot_dimension_numbers<[1], [0], [0], [1], [0, 0, 1, 1], [], []>} : vector<2x32xbf16>, vector<32x32xbf16>, vector<2x32xf32> -> vector<2x32xf32>
      %c0_69 = arith.constant 0 : index
      %c0_70 = arith.constant 0 : index
      %102 = vector.load %arg11[%c0_69, %c0_70] : memref<32x32xbf16, #tpu.memory_space<vmem>>, vector<32x32xbf16>
      %103 = arith.truncf %96 : vector<2x32xf32> to vector<2x32xbf16>
      %cst_71 = arith.constant dense<0.000000e+00> : vector<2x32xf32>
      %104 = tpu.matmul %103, %102, %cst_71 {dimension_numbers = #tpu.dot_dimension_numbers<[1], [0], [0], [1], [0, 0, 1, 1], [], []>} : vector<2x32xbf16>, vector<32x32xbf16>, vector<2x32xf32> -> vector<2x32xf32>
      %105 = arith.addf %101, %104 : vector<2x32xf32>
      %c0_72 = arith.constant 0 : index
      %c0_73 = arith.constant 0 : index
      %106 = vector.load %arg12[%c0_72, %c0_73] : memref<1x32xf32, #tpu.memory_space<vmem>>, vector<1x32xf32>
      %107 = vector.broadcast %106 : vector<1x32xf32> to vector<2x32xf32>
      %108 = arith.addf %105, %107 : vector<2x32xf32>
      %c0_74 = arith.constant 0 : index
      %c0_75 = arith.constant 0 : index
      %109 = vector.load %arg32[%c0_74, %c0_75] : memref<2x32xf32, #tpu.memory_space<vmem>>, vector<2x32xf32>
      tpu.vector_store %arg32[%c0_74, %c0_75], %108 {strides = array<i32>} : memref<2x32xf32, #tpu.memory_space<vmem>>, vector<2x32xf32>,
      %c0_76 = arith.constant 0 : index
      %c0_77 = arith.constant 0 : index
      %110 = vector.load %arg13[%c0_76, %c0_77] : memref<32x32xbf16, #tpu.memory_space<vmem>>, vector<32x32xbf16>
      %111 = arith.truncf %108 : vector<2x32xf32> to vector<2x32xbf16>
      %cst_78 = arith.constant dense<0.000000e+00> : vector<2x32xf32>
      %112 = tpu.matmul %111, %110, %cst_78 {dimension_numbers = #tpu.dot_dimension_numbers<[1], [0], [0], [1], [0, 0, 1, 1], [], []>} : vector<2x32xbf16>, vector<32x32xbf16>, vector<2x32xf32> -> vector<2x32xf32>
      %c0_79 = arith.constant 0 : index
      %c0_80 = arith.constant 0 : index
      %113 = vector.load %arg14[%c0_79, %c0_80] : memref<32x32xbf16, #tpu.memory_space<vmem>>, vector<32x32xbf16>
      %114 = arith.truncf %94 : vector<2x32xf32> to vector<2x32xbf16>
      %cst_81 = arith.constant dense<0.000000e+00> : vector<2x32xf32>
      %115 = tpu.matmul %114, %113, %cst_81 {dimension_numbers = #tpu.dot_dimension_numbers<[1], [0], [0], [1], [0, 0, 1, 1], [], []>} : vector<2x32xbf16>, vector<32x32xbf16>, vector<2x32xf32> -> vector<2x32xf32>
      %116 = arith.addf %112, %115 : vector<2x32xf32>
      %c0_82 = arith.constant 0 : index
      %c0_83 = arith.constant 0 : index
      %117 = vector.load %arg15[%c0_82, %c0_83] : memref<1x32xf32, #tpu.memory_space<vmem>>, vector<1x32xf32>
      %118 = vector.broadcast %117 : vector<1x32xf32> to vector<2x32xf32>
      %119 = arith.addf %116, %118 : vector<2x32xf32>
      %cst_84 = arith.constant 0.000000e+00 : f32
      %120 = vector.broadcast %cst_84 : f32 to vector<2x32xf32>
      %121 = arith.maximumf %119, %120 : vector<2x32xf32>
      %c0_85 = arith.constant 0 : index
      %c0_86 = arith.constant 0 : index
      %122 = vector.load %arg16[%c0_85, %c0_86] : memref<32x96xbf16, #tpu.memory_space<vmem>>, vector<32x96xbf16>
      %123 = arith.truncf %121 : vector<2x32xf32> to vector<2x32xbf16>
      %cst_87 = arith.constant dense<0.000000e+00> : vector<2x96xf32>
      %124 = tpu.matmul %123, %122, %cst_87 {dimension_numbers = #tpu.dot_dimension_numbers<[1], [0], [0], [1], [0, 0, 1, 1], [], []>} : vector<2x32xbf16>, vector<32x96xbf16>, vector<2x96xf32> -> vector<2x96xf32>
      %c0_88 = arith.constant 0 : index
      %c0_89 = arith.constant 0 : index
      %125 = vector.load %arg18[%c0_88, %c0_89] : memref<1x96xf32, #tpu.memory_space<vmem>>, vector<1x96xf32>
      %126 = vector.broadcast %125 : vector<1x96xf32> to vector<2x96xf32>
      %127 = arith.addf %124, %126 : vector<2x96xf32>
      %c0_90 = arith.constant 0 : index
      %c0_91 = arith.constant 0 : index
      %128 = vector.load %arg17[%c0_90, %c0_91] : memref<32x96xbf16, #tpu.memory_space<vmem>>, vector<32x96xbf16>
      %129 = arith.truncf %27 : vector<2x32xf32> to vector<2x32xbf16>
      %cst_92 = arith.constant dense<0.000000e+00> : vector<2x96xf32>
      %130 = tpu.matmul %129, %128, %cst_92 {dimension_numbers = #tpu.dot_dimension_numbers<[1], [0], [0], [1], [0, 0, 1, 1], [], []>} : vector<2x32xbf16>, vector<32x96xbf16>, vector<2x96xf32> -> vector<2x96xf32>
      %c0_93 = arith.constant 0 : index
      %c0_94 = arith.constant 0 : index
      %131 = vector.load %arg19[%c0_93, %c0_94] : memref<1x96xf32, #tpu.memory_space<vmem>>, vector<1x96xf32>
      %132 = vector.broadcast %131 : vector<1x96xf32> to vector<2x96xf32>
      %133 = arith.addf %130, %132 : vector<2x96xf32>
      %134 = vector.extract_strided_slice %127 {offsets = [0, 0], sizes = [2, 32], strides = [1, 1]} : vector<2x96xf32> to vector<2x32xf32>
      %135 = vector.extract_strided_slice %127 {offsets = [0, 32], sizes = [2, 32], strides = [1, 1]} : vector<2x96xf32> to vector<2x32xf32>
      %136 = vector.extract_strided_slice %127 {offsets = [0, 64], sizes = [2, 32], strides = [1, 1]} : vector<2x96xf32> to vector<2x32xf32>
      %137 = vector.extract_strided_slice %133 {offsets = [0, 0], sizes = [2, 32], strides = [1, 1]} : vector<2x96xf32> to vector<2x32xf32>
      %138 = vector.extract_strided_slice %133 {offsets = [0, 32], sizes = [2, 32], strides = [1, 1]} : vector<2x96xf32> to vector<2x32xf32>
      %139 = vector.extract_strided_slice %133 {offsets = [0, 64], sizes = [2, 32], strides = [1, 1]} : vector<2x96xf32> to vector<2x32xf32>
      %140 = arith.addf %134, %137 : vector<2x32xf32>
      %141 = arith.negf %140 : vector<2x32xf32>
      %142 = math.exp %141 : vector<2x32xf32>
      %cst_95 = arith.constant 1.000000e+00 : f32
      %143 = vector.broadcast %cst_95 : f32 to vector<2x32xf32>
      %144 = arith.addf %143, %142 : vector<2x32xf32>
      %145 = arith.divf %143, %144 : vector<2x32xf32>
      %146 = arith.addf %135, %138 : vector<2x32xf32>
      %147 = arith.negf %146 : vector<2x32xf32>
      %148 = math.exp %147 : vector<2x32xf32>
      %cst_96 = arith.constant 1.000000e+00 : f32
      %149 = vector.broadcast %cst_96 : f32 to vector<2x32xf32>
      %150 = arith.addf %149, %148 : vector<2x32xf32>
      %151 = arith.divf %149, %150 : vector<2x32xf32>
      %152 = arith.mulf %145, %139 : vector<2x32xf32>
      %153 = arith.addf %136, %152 : vector<2x32xf32>
      %154 = math.tanh %153 : vector<2x32xf32>
      %cst_97 = arith.constant 1.000000e+00 : f32
      %155 = vector.broadcast %cst_97 : f32 to vector<2x32xf32>
      %156 = arith.subf %155, %151 : vector<2x32xf32>
      %157 = arith.mulf %156, %154 : vector<2x32xf32>
      %158 = arith.mulf %151, %27 : vector<2x32xf32>
      %159 = arith.addf %157, %158 : vector<2x32xf32>
      %c0_98 = arith.constant 0 : index
      %c0_99 = arith.constant 0 : index
      %160 = vector.load %arg27[%c0_98, %c0_99] : memref<2x32xf32, #tpu.memory_space<vmem>>, vector<2x32xf32>
      tpu.vector_store %arg27[%c0_98, %c0_99], %159 {strides = array<i32>} : memref<2x32xf32, #tpu.memory_space<vmem>>, vector<2x32xf32>,
      %c0_100 = arith.constant 0 : index
      %c0_101 = arith.constant 0 : index
      %161 = vector.load %arg20[%c0_100, %c0_101] : memref<32x32xbf16, #tpu.memory_space<vmem>>, vector<32x32xbf16>
      %162 = vector.shape_cast %161 : vector<32x32xbf16> to vector<1x32x32xbf16>
      %163 = vector.shape_cast %162 : vector<1x32x32xbf16> to vector<1x32x32xbf16>
      %164 = vector.broadcast %163 : vector<1x32x32xbf16> to vector<2x32x32xbf16>
      %165 = arith.truncf %26 : vector<2x8x32xf32> to vector<2x8x32xbf16>
      %cst_102 = arith.constant dense<0.000000e+00> : vector<2x8x32xf32>
      %166 = tpu.matmul %165, %164, %cst_102 {dimension_numbers = #tpu.dot_dimension_numbers<[2], [1], [1], [2], [0, 0, 0, 1, 1, 2], [0], [0]>} : vector<2x8x32xbf16>, vector<2x32x32xbf16>, vector<2x8x32xf32> -> vector<2x8x32xf32>
      %c0_103 = arith.constant 0 : index
      %c0_104 = arith.constant 0 : index
      %167 = vector.load %arg21[%c0_103, %c0_104] : memref<1x32xf32, #tpu.memory_space<vmem>>, vector<1x32xf32>
      %168 = vector.shape_cast %167 : vector<1x32xf32> to vector<1x1x32xf32>
      %169 = vector.broadcast %168 : vector<1x1x32xf32> to vector<2x8x32xf32>
      %170 = arith.addf %166, %169 : vector<2x8x32xf32>
      %171 = arith.negf %170 : vector<2x8x32xf32>
      %172 = math.exp %171 : vector<2x8x32xf32>
      %cst_105 = arith.constant 1.000000e+00 : f32
      %173 = vector.broadcast %cst_105 : f32 to vector<2x8x32xf32>
      %174 = arith.addf %173, %172 : vector<2x8x32xf32>
      %175 = arith.divf %173, %174 : vector<2x8x32xf32>
      %176 = vector.shape_cast %159 : vector<2x32xf32> to vector<2x1x32xf32>
      %177 = vector.broadcast %176 : vector<2x1x32xf32> to vector<2x8x32xf32>
      %178 = arith.mulf %175, %177 : vector<2x8x32xf32>
      %cst_106 = arith.constant dense<0.000000e+00> : vector<2x8xf32>
      %179 = vector.multi_reduction <add>, %178, %cst_106 [2] : vector<2x8x32xf32> to vector<2x8xf32>
      %cst_107 = arith.constant dense<0xFF800000> : vector<2xf32>
      %180 = vector.multi_reduction <maximumf>, %179, %cst_107 [1] : vector<2x8xf32> to vector<2xf32>
      %181 = vector.shape_cast %180 : vector<2xf32> to vector<2x1xf32>
      %182 = vector.broadcast %181 : vector<2x1xf32> to vector<2x8xf32>
      %183 = arith.subf %179, %182 : vector<2x8xf32>
      %184 = math.exp %183 : vector<2x8xf32>
      %cst_108 = arith.constant dense<0.000000e+00> : vector<2xf32>
      %185 = vector.multi_reduction <add>, %184, %cst_108 [1] : vector<2x8xf32> to vector<2xf32>
      %186 = vector.shape_cast %185 : vector<2xf32> to vector<2x1xf32>
      %187 = tpu.reciprocal %186 {approx = true} : vector<2x1xf32> -> vector<2x1xf32>
      %188 = vector.broadcast %187 : vector<2x1xf32> to vector<2x8xf32>
      %189 = arith.mulf %184, %188 : vector<2x8xf32>
      %c0_109 = arith.constant 0 : index
      %c0_110 = arith.constant 0 : index
      %190 = vector.load %arg29[%c0_109, %c0_110] : memref<2x8xf32, #tpu.memory_space<vmem>>, vector<2x8xf32>
      tpu.vector_store %arg29[%c0_109, %c0_110], %189 {strides = array<i32>} : memref<2x8xf32, #tpu.memory_space<vmem>>, vector<2x8xf32>,
    } else {
    }
    %c0 = arith.constant 0 : index
    %c0_1 = arith.constant 0 : index
    %3 = vector.load %arg32[%c0, %c0_1] : memref<2x32xf32, #tpu.memory_space<vmem>>, vector<2x32xf32>
    %c0_2 = arith.constant 0 : index
    %c0_3 = arith.constant 0 : index
    %4 = vector.load %arg31[%c0_2, %c0_3] : memref<2x32xf32, #tpu.memory_space<vmem>>, vector<2x32xf32>
    %c0_4 = arith.constant 0 : index
    %c0_5 = arith.constant 0 : index
    %5 = vector.load %arg27[%c0_4, %c0_5] : memref<2x32xf32, #tpu.memory_space<vmem>>, vector<2x32xf32>
    %c0_6 = arith.constant 0 : index
    %c0_7 = arith.constant 0 : index
    %6 = vector.load %arg22[%c0_6, %c0_7] : memref<32x128xbf16, #tpu.memory_space<vmem>>, vector<32x128xbf16>
    %7 = arith.truncf %3 : vector<2x32xf32> to vector<2x32xbf16>
    %cst = arith.constant dense<0.000000e+00> : vector<2x128xf32>
    %8 = tpu.matmul %7, %6, %cst {dimension_numbers = #tpu.dot_dimension_numbers<[1], [0], [0], [1], [0, 0, 1, 1], [], []>} : vector<2x32xbf16>, vector<32x128xbf16>, vector<2x128xf32> -> vector<2x128xf32>
    %c0_8 = arith.constant 0 : index
    %c0_9 = arith.constant 0 : index
    %9 = vector.load %arg23[%c0_8, %c0_9] : memref<32x128xbf16, #tpu.memory_space<vmem>>, vector<32x128xbf16>
    %10 = arith.truncf %4 : vector<2x32xf32> to vector<2x32xbf16>
    %cst_10 = arith.constant dense<0.000000e+00> : vector<2x128xf32>
    %11 = tpu.matmul %10, %9, %cst_10 {dimension_numbers = #tpu.dot_dimension_numbers<[1], [0], [0], [1], [0, 0, 1, 1], [], []>} : vector<2x32xbf16>, vector<32x128xbf16>, vector<2x128xf32> -> vector<2x128xf32>
    %12 = arith.addf %8, %11 : vector<2x128xf32>
    %c0_11 = arith.constant 0 : index
    %c0_12 = arith.constant 0 : index
    %13 = vector.load %arg24[%c0_11, %c0_12] : memref<32x128xbf16, #tpu.memory_space<vmem>>, vector<32x128xbf16>
    %14 = arith.truncf %5 : vector<2x32xf32> to vector<2x32xbf16>
    %cst_13 = arith.constant dense<0.000000e+00> : vector<2x128xf32>
    %15 = tpu.matmul %14, %13, %cst_13 {dimension_numbers = #tpu.dot_dimension_numbers<[1], [0], [0], [1], [0, 0, 1, 1], [], []>} : vector<2x32xbf16>, vector<32x128xbf16>, vector<2x128xf32> -> vector<2x128xf32>
    %16 = arith.addf %12, %15 : vector<2x128xf32>
    %c0_14 = arith.constant 0 : index
    %c0_15 = arith.constant 0 : index
    %17 = vector.load %arg25[%c0_14, %c0_15] : memref<1x128xf32, #tpu.memory_space<vmem>>, vector<1x128xf32>
    %18 = vector.broadcast %17 : vector<1x128xf32> to vector<2x128xf32>
    %19 = arith.addf %16, %18 : vector<2x128xf32>
    %20 = vector.shape_cast %19 : vector<2x128xf32> to vector<2x1x128xf32>
    %c0_16 = arith.constant 0 : index
    %21 = arith.index_cast %arg0 : i32 to index
    %c0_17 = arith.constant 0 : index
    %22 = vector.load %arg26[%c0_16, %21, %c0_17] : memref<2x1x128xf32, #tpu.memory_space<vmem>>, vector<2x1x128xf32>
    tpu.vector_store %arg26[%c0_16, %21, %c0_17], %20 {strides = array<i32>} : memref<2x1x128xf32, #tpu.memory_space<vmem>>, vector<2x1x128xf32>,
    %c0_i32_18 = arith.constant 0 : i32
    %23 = arith.cmpi eq, %arg0, %c0_i32_18 : i32
    %24 = arith.extui %23 : i1 to i32
    %c0_i32_19 = arith.constant 0 : i32
    %25 = arith.cmpi ne, %24, %c0_i32_19 : i32
    scf.if %25 {
      %c0_20 = arith.constant 0 : index
      %c0_21 = arith.constant 0 : index
      %c0_22 = arith.constant 0 : index
      %26 = vector.load %arg26[%c0_20, %c0_21, %c0_22] : memref<2x1x128xf32, #tpu.memory_space<vmem>>, vector<2x1x128xf32>
      %cst_23 = arith.constant dense<0xFF800000> : vector<2x1xf32>
      %27 = vector.multi_reduction <maximumf>, %26, %cst_23 [2] : vector<2x1x128xf32> to vector<2x1xf32>
      %28 = vector.shape_cast %27 : vector<2x1xf32> to vector<2x1x1xf32>
      %cst_24 = arith.constant dense<0xFF800000> : vector<2x1xf32>
      %29 = vector.multi_reduction <maximumf>, %28, %cst_24 [1] : vector<2x1x1xf32> to vector<2x1xf32>
      %30 = vector.shape_cast %29 : vector<2x1xf32> to vector<2x1x1xf32>
      %31 = vector.broadcast %30 : vector<2x1x1xf32> to vector<2x1x128xf32>
      %32 = arith.subf %26, %31 : vector<2x1x128xf32>
      %33 = math.exp %32 : vector<2x1x128xf32>
      %cst_25 = arith.constant dense<0.000000e+00> : vector<2x1xf32>
      %34 = vector.multi_reduction <add>, %33, %cst_25 [2] : vector<2x1x128xf32> to vector<2x1xf32>
      %35 = vector.shape_cast %34 : vector<2x1xf32> to vector<2x1x1xf32>
      %cst_26 = arith.constant dense<0.000000e+00> : vector<2x1xf32>
      %36 = vector.multi_reduction <add>, %35, %cst_26 [1] : vector<2x1x1xf32> to vector<2x1xf32>
      %37 = vector.shape_cast %36 : vector<2x1xf32> to vector<2x1x1xf32>
      %38 = tpu.reciprocal %37 {approx = true} : vector<2x1x1xf32> -> vector<2x1x1xf32>
      %39 = vector.broadcast %38 : vector<2x1x1xf32> to vector<2x1x128xf32>
      %40 = arith.mulf %33, %39 : vector<2x1x128xf32>
      %c0_27 = arith.constant 0 : index
      %c0_28 = arith.constant 0 : index
      %c0_29 = arith.constant 0 : index
      %41 = vector.load %arg26[%c0_27, %c0_28, %c0_29] : memref<2x1x128xf32, #tpu.memory_space<vmem>>, vector<2x1x128xf32>
      tpu.vector_store %arg26[%c0_27, %c0_28, %c0_29], %40 {strides = array<i32>} : memref<2x1x128xf32, #tpu.memory_space<vmem>>, vector<2x1x128xf32>,
      %c0_30 = arith.constant 0 : index
      %c0_31 = arith.constant 0 : index
      %42 = vector.load %arg28[%c0_30, %c0_31] : memref<2x8xf32, #tpu.memory_space<vmem>>, vector<2x8xf32>
      %c0_32 = arith.constant 0 : index
      %c0_33 = arith.constant 0 : index
      %43 = vector.load %arg5[%c0_32, %c0_33] : memref<2x8xi32, #tpu.memory_space<vmem>>, vector<2x8xi32>
      %44 = arith.sitofp %43 : vector<2x8xi32> to vector<2x8xf32>
      %45 = tpu.iota {dimensions = array<i32: 1>} : vector<2x8xi32>
      %46 = tpu.iota {dimensions = array<i32: 1>} : vector<2x1x128xi32>
      %c128_i32 = arith.constant 128 : i32
      %47 = vector.broadcast %c128_i32 : i32 to vector<2x1x128xi32>
      %48 = arith.muli %46, %47 : vector<2x1x128xi32>
      %49 = tpu.iota {dimensions = array<i32: 2>} : vector<2x1x128xi32>
      %50 = arith.addi %48, %49 : vector<2x1x128xi32>
      %51 = arith.sitofp %50 : vector<2x1x128xi32> to vector<2x1x128xf32>
      %c0_i32_34 = arith.constant 0 : i32
      %c8_i32 = arith.constant 8 : i32
      %52 = arith.addi %c0_i32_34, %c8_i32 : i32
      %c1_i32 = arith.constant 1 : i32
      scf.for %arg34 = %c0_i32_34 to %52 step %c1_i32  : i32 {
        %c1_i32_36 = arith.constant 1 : i32
        %53 = arith.muli %arg34, %c1_i32_36 : i32
        %c0_i32_37 = arith.constant 0 : i32
        %54 = arith.addi %c0_i32_37, %53 : i32
        %55 = vector.broadcast %54 : i32 to vector<2x8xi32>
        %56 = arith.cmpi eq, %45, %55 : vector<2x8xi32>
        %cst_38 = arith.constant 0.000000e+00 : f32
        %57 = vector.broadcast %cst_38 : f32 to vector<2x8xf32>
        %58 = arith.select %56, %42, %57 : vector<2x8xi1>, vector<2x8xf32>
        %cst_39 = arith.constant dense<0.000000e+00> : vector<2xf32>
        %59 = vector.multi_reduction <add>, %58, %cst_39 [1] : vector<2x8xf32> to vector<2xf32>
        %60 = vector.shape_cast %59 : vector<2xf32> to vector<2x1xf32>
        %cst_40 = arith.constant 0.000000e+00 : f32
        %61 = vector.broadcast %cst_40 : f32 to vector<2x8xf32>
        %62 = arith.select %56, %44, %61 : vector<2x8xi1>, vector<2x8xf32>
        %cst_41 = arith.constant dense<0.000000e+00> : vector<2xf32>
        %63 = vector.multi_reduction <add>, %62, %cst_41 [1] : vector<2x8xf32> to vector<2xf32>
        %64 = vector.shape_cast %63 : vector<2xf32> to vector<2x1xf32>
        %65 = vector.shape_cast %64 : vector<2x1xf32> to vector<2x1x1xf32>
        %66 = vector.broadcast %65 : vector<2x1x1xf32> to vector<2x1x128xf32>
        %67 = arith.cmpf oeq, %51, %66 : vector<2x1x128xf32>
        %68 = arith.extui %67 : vector<2x1x128xi1> to vector<2x1x128xi32>
        %69 = arith.sitofp %68 : vector<2x1x128xi32> to vector<2x1x128xf32>
        %c0_42 = arith.constant 0 : index
        %c0_43 = arith.constant 0 : index
        %c0_44 = arith.constant 0 : index
        %70 = vector.load %arg26[%c0_42, %c0_43, %c0_44] : memref<2x1x128xf32, #tpu.memory_space<vmem>>, vector<2x1x128xf32>
        %71 = vector.shape_cast %60 : vector<2x1xf32> to vector<2x1x1xf32>
        %72 = vector.broadcast %71 : vector<2x1x1xf32> to vector<2x1x128xf32>
        %73 = arith.mulf %72, %69 : vector<2x1x128xf32>
        %74 = arith.addf %70, %73 : vector<2x1x128xf32>
        %c0_45 = arith.constant 0 : index
        %c0_46 = arith.constant 0 : index
        %c0_47 = arith.constant 0 : index
        %75 = vector.load %arg26[%c0_45, %c0_46, %c0_47] : memref<2x1x128xf32, #tpu.memory_space<vmem>>, vector<2x1x128xf32>
        tpu.vector_store %arg26[%c0_45, %c0_46, %c0_47], %74 {strides = array<i32>} : memref<2x1x128xf32, #tpu.memory_space<vmem>>, vector<2x1x128xf32>,
      }
      %c8_i32_35 = arith.constant 8 : i32
    } else {
    }
    return
  }
  func.func @transform_0(%arg0: i32) -> i32 {
    %c0_i32 = arith.constant 0 : i32
    %c0_i32_0 = arith.constant 0 : i32
    return %c0_i32 : i32
  }
  func.func @transform_1(%arg0: i32) -> (i32, i32) {
    %c0_i32 = arith.constant 0 : i32
    %c0_i32_0 = arith.constant 0 : i32
    %c0_i32_1 = arith.constant 0 : i32
    return %c0_i32, %c0_i32_0 : i32, i32
  }
  func.func @transform_2(%arg0: i32) -> (i32, i32) {
    %c0_i32 = arith.constant 0 : i32
    %c0_i32_0 = arith.constant 0 : i32
    %c0_i32_1 = arith.constant 0 : i32
    return %c0_i32, %c0_i32_0 : i32, i32
  }
  func.func @transform_3(%arg0: i32) -> (i32, i32, i32) {
    %c0_i32 = arith.constant 0 : i32
    %c0_i32_0 = arith.constant 0 : i32
    %c0_i32_1 = arith.constant 0 : i32
    %c0_i32_2 = arith.constant 0 : i32
    return %c0_i32, %c0_i32_0, %c0_i32_1 : i32, i32, i32
  }
  func.func @transform_4(%arg0: i32) -> (i32, i32) {
    %c0_i32 = arith.constant 0 : i32
    %c0_i32_0 = arith.constant 0 : i32
    %c0_i32_1 = arith.constant 0 : i32
    return %c0_i32, %c0_i32_0 : i32, i32
  }
  func.func @transform_6(%arg0: i32) -> (i32, i32) {
    %c0_i32 = arith.constant 0 : i32
    %c0_i32_0 = arith.constant 0 : i32
    %c0_i32_1 = arith.constant 0 : i32
    return %c0_i32, %c0_i32_0 : i32, i32
  }
  func.func @transform_7(%arg0: i32) -> (i32, i32) {
    %c0_i32 = arith.constant 0 : i32
    %c0_i32_0 = arith.constant 0 : i32
    %c0_i32_1 = arith.constant 0 : i32
    return %c0_i32, %c0_i32_0 : i32, i32
  }
  func.func @transform_8(%arg0: i32) -> (i32, i32) {
    %c0_i32 = arith.constant 0 : i32
    %c0_i32_0 = arith.constant 0 : i32
    %c0_i32_1 = arith.constant 0 : i32
    return %c0_i32, %c0_i32_0 : i32, i32
  }
  func.func @transform_9(%arg0: i32) -> (i32, i32) {
    %c0_i32 = arith.constant 0 : i32
    %c0_i32_0 = arith.constant 0 : i32
    %c0_i32_1 = arith.constant 0 : i32
    return %c0_i32, %c0_i32_0 : i32, i32
  }
  func.func @transform_10(%arg0: i32) -> (i32, i32) {
    %c0_i32 = arith.constant 0 : i32
    %c0_i32_0 = arith.constant 0 : i32
    %c0_i32_1 = arith.constant 0 : i32
    return %c0_i32, %c0_i32_0 : i32, i32
  }
  func.func @transform_11(%arg0: i32) -> (i32, i32) {
    %c0_i32 = arith.constant 0 : i32
    %c0_i32_0 = arith.constant 0 : i32
    %c0_i32_1 = arith.constant 0 : i32
    return %c0_i32, %c0_i32_0 : i32, i32
  }
  func.func @transform_12(%arg0: i32) -> (i32, i32) {
    %c0_i32 = arith.constant 0 : i32
    %c0_i32_0 = arith.constant 0 : i32
    %c0_i32_1 = arith.constant 0 : i32
    return %c0_i32, %c0_i32_0 : i32, i32
  }
  func.func @transform_13(%arg0: i32) -> (i32, i32) {
    %c0_i32 = arith.constant 0 : i32
    %c0_i32_0 = arith.constant 0 : i32
    %c0_i32_1 = arith.constant 0 : i32
    return %c0_i32, %c0_i32_0 : i32, i32
  }
  func.func @transform_14(%arg0: i32) -> (i32, i32) {
    %c0_i32 = arith.constant 0 : i32
    %c0_i32_0 = arith.constant 0 : i32
    %c0_i32_1 = arith.constant 0 : i32
    return %c0_i32, %c0_i32_0 : i32, i32
  }
  func.func @transform_15(%arg0: i32) -> (i32, i32) {
    %c0_i32 = arith.constant 0 : i32
    %c0_i32_0 = arith.constant 0 : i32
    %c0_i32_1 = arith.constant 0 : i32
    return %c0_i32, %c0_i32_0 : i32, i32
  }
  func.func @transform_16(%arg0: i32) -> (i32, i32) {
    %c0_i32 = arith.constant 0 : i32
    %c0_i32_0 = arith.constant 0 : i32
    %c0_i32_1 = arith.constant 0 : i32
    return %c0_i32, %c0_i32_0 : i32, i32
  }
  func.func @transform_17(%arg0: i32) -> (i32, i32) {
    %c0_i32 = arith.constant 0 : i32
    %c0_i32_0 = arith.constant 0 : i32
    %c0_i32_1 = arith.constant 0 : i32
    return %c0_i32, %c0_i32_0 : i32, i32
  }
  func.func @transform_18(%arg0: i32) -> (i32, i32) {
    %c0_i32 = arith.constant 0 : i32
    %c0_i32_0 = arith.constant 0 : i32
    %c0_i32_1 = arith.constant 0 : i32
    return %c0_i32, %c0_i32_0 : i32, i32
  }
  func.func @transform_19(%arg0: i32) -> (i32, i32) {
    %c0_i32 = arith.constant 0 : i32
    %c0_i32_0 = arith.constant 0 : i32
    %c0_i32_1 = arith.constant 0 : i32
    return %c0_i32, %c0_i32_0 : i32, i32
  }
  func.func @transform_20(%arg0: i32) -> (i32, i32) {
    %c0_i32 = arith.constant 0 : i32
    %c0_i32_0 = arith.constant 0 : i32
    %c0_i32_1 = arith.constant 0 : i32
    return %c0_i32, %c0_i32_0 : i32, i32
  }
  func.func @transform_21(%arg0: i32) -> (i32, i32) {
    %c0_i32 = arith.constant 0 : i32
    %c0_i32_0 = arith.constant 0 : i32
    return %c0_i32, %arg0 : i32, i32
  }
  func.func @transform_22(%arg0: i32) -> (i32, i32) {
    %c0_i32 = arith.constant 0 : i32
    %c0_i32_0 = arith.constant 0 : i32
    return %c0_i32, %arg0 : i32, i32
  }
  func.func @transform_23(%arg0: i32) -> (i32, i32) {
    %c0_i32 = arith.constant 0 : i32
    %c0_i32_0 = arith.constant 0 : i32
    return %c0_i32, %arg0 : i32, i32
  }
  func.func @transform_24(%arg0: i32) -> (i32, i32) {
    %c0_i32 = arith.constant 0 : i32
    %c0_i32_0 = arith.constant 0 : i32
    return %c0_i32, %arg0 : i32, i32
  }
  func.func @transform_25(%arg0: i32) -> (i32, i32, i32) {
    %c0_i32 = arith.constant 0 : i32
    %c0_i32_0 = arith.constant 0 : i32
    %c0_i32_1 = arith.constant 0 : i32
    %c0_i32_2 = arith.constant 0 : i32
    return %c0_i32, %c0_i32_0, %c0_i32_1 : i32, i32, i32
  }
  func.func @transform_26(%arg0: i32) -> (i32, i32) {
    %c0_i32 = arith.constant 0 : i32
    %c0_i32_0 = arith.constant 0 : i32
    %c0_i32_1 = arith.constant 0 : i32
    return %c0_i32, %c0_i32_0 : i32, i32
  }
  func.func @transform_27(%arg0: i32) -> (i32, i32) {
    %c0_i32 = arith.constant 0 : i32
    %c0_i32_0 = arith.constant 0 : i32
    %c0_i32_1 = arith.constant 0 : i32
    return %c0_i32, %c0_i32_0 : i32, i32
  }
  func.func @transform_28(%arg0: i32) -> (i32, i32) {
    %c0_i32 = arith.constant 0 : i32
    %c0_i32_0 = arith.constant 0 : i32
    %c0_i32_1 = arith.constant 0 : i32
    return %c0_i32, %c0_i32_0 : i32, i32
  }
}

</mosaic_0001>

<bundles_post_ra>
// kernel: tpu_custom_call.1
= control target key start
LH: loop header
LB: loop body
LE: loop exit
PB: predicated region body
PF: predicated region fallthrough
CT: control target
= control target key end

     0   :  { %s2589_s0 = inlined_call_operand.hbm [shape: s32[2], index: 0, kind: input, shape index: {}]   ;;  %s2590_s1 = inlined_call_operand.vmem [shape: s32[2,1], index: 1, kind: input, shape index: {}]   ;;  %s2591_s2 = inlined_call_operand.vmem [shape: f32[2,32], index: 2, kind: input, shape index: {}]   ;;  %s2592_s3 = inlined_call_operand.vmem [shape: f32[2,8,32], index: 3, kind: input, shape index: {}]   ;;  %s2593_s4 = inlined_call_operand.vmem [shape: s32[2,8], index: 4, kind: input, shape index: {}]   ;;  %s2594_s5 = inlined_call_operand.vmem [shape: f32[128,32], index: 5, kind: input, shape index: {}]   ;;  %s2595_s6 = inlined_call_operand.vmem [shape: f32[1,32], index: 6, kind: input, shape index: {}]   ;;  %s2596_s7 = inlined_call_operand.vmem [shape: f32[1,32], index: 7, kind: input, shape index: {}]   ;;  %s2597_s8 = inlined_call_operand.<no memory space> [shape: f32[1,1], index: 8, kind: input, shape index: {}]   ;;  %s2598_s9 = inlined_call_operand.vmem [shape: bf16[32,32], index: 9, kind: input, shape index: {}]   ;;  %s2599_s10 = inlined_call_operand.vmem [shape: bf16[32,32], index: 10, kind: input, shape index: {}]   ;;  %s2600_s11 = inlined_call_operand.vmem [shape: f32[1,32], index: 11, kind: input, shape index: {}]   ;;  %s2601_s12 = inlined_call_operand.vmem [shape: bf16[32,32], index: 12, kind: input, shape index: {}]   ;;  %s2602_s13 = inlined_call_operand.vmem [shape: bf16[32,32], index: 13, kind: input, shape index: {}]   ;;  %s2603_s14 = inlined_call_operand.vmem [shape: f32[1,32], index: 14, kind: input, shape index: {}]   ;;  %s2604_s15 = inlined_call_operand.vmem [shape: bf16[32,96], index: 15, kind: input, shape index: {}]   ;;  %s2605_s16 = inlined_call_operand.vmem [shape: bf16[32,96], index: 16, kind: input, shape index: {}]   ;;  %s2606_s17 = inlined_call_operand.vmem [shape: f32[1,96], index: 17, kind: input, shape index: {}]   ;;  %s2607_s18 = inlined_call_operand.vmem [shape: f32[1,96], index: 18, kind: input, shape index: {}]   ;;  %s2608_s19 = inlined_call_operand.vmem [shape: bf16[32,32], index: 19, kind: input, shape index: {}]   ;;  %s2609_s20 = inlined_call_operand.vmem [shape: f32[1,32], index: 20, kind: input, shape index: {}]   ;;  %s2610_s21 = inlined_call_operand.vmem [shape: bf16[32,128], index: 21, kind: input, shape index: {}]   ;;  %s2611_s22 = inlined_call_operand.vmem [shape: bf16[32,128], index: 22, kind: input, shape index: {}]   ;;  %s2612_s23 = inlined_call_operand.vmem [shape: bf16[32,128], index: 23, kind: input, shape index: {}]   ;;  %s2613_s24 = inlined_call_operand.vmem [shape: f32[1,128], index: 24, kind: input, shape index: {}]   ;;  %s2614_s25 = inlined_call_operand.hbm [shape: f32[2,1,128], index: 25, kind: output, shape index: {0}]   ;;  %s2615_s26 = inlined_call_operand.hbm [shape: f32[2,32], index: 26, kind: output, shape index: {1}]   ;;  %s2616_s27 = inlined_call_operand.hbm [shape: f32[2,8], index: 27, kind: output, shape index: {2}]   ;;  %s2617_s28 = inlined_call_operand.hbm [shape: f32[2,8], index: 28, kind: output, shape index: {3}]  }
   0x1   :  { %2625 = sst [smem:[#allocation24_spill]] %s2589_s0 }
   0x2   :  { %2626 = sst [smem:[#allocation25_spill]] %s2590_s1 }
   0x3   :  { %2627 = sst [smem:[#allocation26_spill]] %s2591_s2 }
   0x4   :  { %2628 = sst [smem:[#allocation27_spill]] %s2592_s3 }
   0x5   :  { %2629 = sst [smem:[#allocation28_spill]] %s2593_s4 }
   0x6   :  { %2630 = sst [smem:[#allocation29_spill]] %s2594_s5 }
   0x7   :  { %2631 = sst [smem:[#allocation30_spill]] %s2595_s6 }
   0x8   :  { %2632 = sst [smem:[#allocation31_spill]] %s2596_s7 }
   0x9   :  { %2633 = sst [smem:[#allocation32_spill]] %s2597_s8 }
   0xa   :  { %2634 = sst [smem:[#allocation33_spill]] %s2598_s9  ;;  %s2638_s9 = sld [smem:[#allocation32_spill]] }
   0xb   :  { %2635 = sst [smem:[#allocation34_spill]] %s2599_s10 }
   0xc   :  { %2636 = sst [smem:[#allocation35_spill]] %s2600_s11 }
   0xd   :  { %2637 = sst [smem:[#allocation36_spill]] %s2601_s12 }
  0x10   :  { %v34_v0 = vstv %s2638_s9 }
  0x11   :  { %35 = vst [vmem:[#allocation6] sm:$0x1] %v34_v0 }
  0x12   :  { %36 = vsyncpa [#allocation9], 0 }
  0x13   :  { %37 = vsyncpa [#allocation8], 0 }
  0x14   :  { %38 = vsyncpa [#allocation12], 0 }
  0x15   :  { %39 = vsyncpa [#allocation15], 0  ;;  %s2639_s6 = sld [smem:[#allocation24_spill]] }
  0x1b   :  { %s1922_s10 = scalar_lea.hbm %s2639_s6, 16 }
  0x1c   :  { %p1923_p0 = scmp.ne.s32.totalorder %s2639_s6, %s1922_s10  ;;  %p1926_p1 = scmp.lt.u32.totalorder %s1922_s10, %s2639_s6 }
  0x1e   :  { %p1928_p2 = pnand %p1926_p1, %p1923_p0 }
  0x20   :  { %1931 = shalt.err (!%p1928_p2)
}
  0x21   :  { %s2040_s7 = smov [#allocation7]  }
  0x22   :  { %47 = dma.hbm_to_smem %s2639_s6, 16, %s2040_s7, [#allocation9]  }
  0x23   :  { %2024 = dma.done.wait [#allocation9], 16  }
  0x24   :  { %2025 = vsyncadd [#allocation9], 4294967280 }
  0x25   :  { %97 = sfence }
  0x26   :  { %s2640_s5 = sld [smem:[#allocation27_spill]]  ;;  %s2641_s0 = sld [smem:[#allocation26_spill]] }
  0x27   :  { %s108_s11 = sld [smem:[#allocation7]]  ;;  %s2642_s2 = sld [smem:[#allocation25_spill]] }
  0x28   :  { %s2643_s1 = sld [smem:[#allocation28_spill]] }
  0x2c   :  { %v2218_v1 = vld [vmem:[%s2640_s5] sm:$0xff]  ;;  %v2223_v2 = vld [vmem:[%s2640_s5 + $0x8] sm:$0xff]  ;;  %s2644_s5 = sld [smem:[#allocation29_spill]] }
  0x2d   :  { %v2228_v3 = vld [vmem:[%s2641_s0] sm:$0x3] }
  0x2e   :  { %v2233_v4 = vld [vmem:[%s2642_s2] sm:$0x3] }
  0x2f   :  { %v2238_v5 = vld [vmem:[%s2643_s1] sm:$0x3] }
  0x32   :  { %s109_s9 = scalar_lea.vmem %s2644_s5, %s108_s11 }
  0x33   :  { %v127_v6 = vld [vmem:[%s109_s9] sm:$0x1] }
  0x34   :  { %128 = vst [vmem:[#allocation2] sm:$0x1] %v127_v6 }
  0x35   :  { %153 = vsyncadd [#allocation5], 16  ;;  %s1647_s30 = sld [smem:[#allocation7 + $0x1]] }
  0x3b   :  { %s155_s0 = scalar_lea.vmem %s2644_s5, %s1647_s30 }
  0x3c   :  { %v175_v7 = vld [vmem:[%s155_s0] sm:$0x1] }
  0x3d   :  { %176 = vst [vmem:[#allocation2 + $0x1] sm:$0x1] %v175_v7 }
  0x3e   :  { %201 = vsyncadd [#allocation5 + $0x1], 16 }
  0x3f   :  { %2026 = dma.done.wait [#allocation5], 16 }
  0x40   :  { %2027 = vsyncadd [#allocation5], 4294967280 }
  0x41   :  { %2028 = dma.done.wait [#allocation5 + $0x1], 16 }
  0x42   :  { %2029 = vsyncadd [#allocation5 + $0x1], 4294967280  ;;  %v236_v8 = vlaneseq  ;;  %v2041_v9 = vmov 0   ;;  %vm231_vm0 = vcmask 254976   ;;  %vm216_vm1 = vcmask 261120   ;;  %s2645_s7 = sld [smem:[#allocation31_spill]] }
  0x43   :  { %1860 = vset.pattern.permute.xlu1 %v2041_v9  ;;  %1861 = vset.pattern.permute.xlu0 %v2041_v9  ;;  %v2257_v14 = vld [vmem:[%s2643_s1] sm:$0x3]  ;;  %s2646_s8 = sld [smem:[#allocation30_spill]]  ;;  %v1650_v25 = vld [vmem:[#allocation6] ss:$0 sm:$0xff]  ;;  %vm280_vm2 = vcmask 1041409  }
  0x44   :  { %v2246_v10 = vshrl.u32 %v236_v8, 7  ;;  %v2248_v11 = vand.u32 127, %v236_v8  ;;  %v1487_v17 = vcvt.s32.f32 %v2257_v14  ;;  %vm283_vm3 = vcmask 58368   ;;  %s2647_s9 = sld [smem:[#allocation33_spill]]  ;;  %s2648_s10 = sld [smem:[#allocation34_spill]] }
  0x45   :  { %v2042_v56 = vmov 0.0   ;;  %vm450_vm5 = vcmask 1043456   ;;  %vm2043_vm6 = vmmov 0   ;;  %vm439_vm7 = vcmask 1040384   ;;  %s2649_s12 = sld [smem:[#allocation36_spill]] }
  0x46   :  { %v1492_v12 = vmul.u32 128, %v2246_v10  ;;  %v2274_v26 = vsub.s32 1, %v2246_v10  ;;  %v2277_v27 = vsub.s32 0, %v2246_v10  ;;  %v2283_v40 = vsub.s32 %v2248_v11, %v2246_v10  ;;  %1737 = vmatprep.subr.bf16.mxu0 %v2042_v56  ;;  %1743 = vmatprep.subr.bf16.mxu1 %v2042_v56 }
  0x47   :  { %1739 = vmatprep.mubr.msk.bf16.mxu0 %vm2043_vm6, %v2042_v56  ;;  %1745 = vmatprep.mubr.msk.bf16.mxu1 %vm2043_vm6, %v2042_v56  ;;  %vm446_vm8 = vcmask 64512  }
  0x48   :  { %v2252_v13 = vadd.s32 %v1492_v12, %v2248_v11  ;;  %v1649_v15 = vld [vmem:[%s2645_s7] ss:$0 sm:$0xff] }
  0x49   :  { %v1648_v16 = vld [vmem:[%s2646_s8] ss:$0 sm:$0xff]  ;;  %v230_v18 = vmul.f32 %v1649_v15, %v2228_v3 }
  0x4a   :  { %v215_v19 = vmul.f32 %v1648_v16, %v2223_v2  ;;  %v214_v20 = vmul.f32 %v1648_v16, %v2218_v1  ;;  %v1494_v21 = vcvt.s32.f32 %v2252_v13 }
  0x4b   :  { %v232_v22 = vsel %vm231_vm0, %v230_v18, 0.0 }
  0x4c   :  { %v220_v23 = vsel %vm216_vm1, %v215_v19, 0.0  ;;  %v217_v24 = vsel %vm216_vm1, %v214_v20, 0.0  ;;  %233 = vadd.xlane.f32.xlu0 %v232_v22 }
  0x4d   :  { %221 = vadd.xlane.f32.xlu1 %v220_v23 }
  0x50   :  { %218 = vadd.xlane.f32.xlu0 %v217_v24 }
  0x5e   :  { %255 = vperm.xlu1 %1860, %v1650_v25  }
  0xd9   :  { %v234_v28 = vpop.xlane.xlu0 %233 }
  0xda   :  { %v222_v29 = vpop.xlane.xlu1 %221  ;;  %v243_v30 = vrot.slane %v234_v28, %v2274_v26  ;;  %v239_v31 = vrot.slane %v234_v28, %v2277_v27 }
  0xdc   :  { %v247_v32 = vadd.f32 %v243_v30, %v222_v29 }
  0xdd   :  { %v219_v34 = vpop.xlane.xlu0 %218 }
  0xde   :  { %v256_v33 = vpop.permute.xlu1 %255  ;;  %v246_v36 = vadd.f32 %v239_v31, %v219_v34 }
  0xdf   :  { %v259_v35 = vadd.f32 %v256_v33, %v247_v32 }
  0xe0   :  { %v258_v37 = vadd.f32 %v256_v33, %v246_v36 }
  0xe1   :  { %1882 = vtanh.f32 %v259_v35 }
  0xe2   :  { %1884 = vtanh.f32 %v258_v37 }
  0xeb   :  { %v1883_v38 = vpop.eup %1882 }
  0xec   :  { %268 = vperm.xlu1 %1860, %v1883_v38   ;;  %v1885_v39 = vpop.eup %1884 }
  0xed   :  { %265 = vperm.xlu0 %1861, %v1885_v39  }
 0x16b   :  { %v269_v41 = vpop.permute.xlu1 %268 }
 0x16c   :  { %v266_v42 = vpop.permute.xlu0 %265  ;;  %v279_v43 = vrot.slane %v269_v41, %v2283_v40 }
 0x16d   :  { %v275_v44 = vrot.slane %v266_v42, %v2283_v40 }
 0x16f   :  { %v281_v45 = vsel %vm280_vm2, %v279_v43, %v275_v44  ;;  %v2318_v43 = vpack.c.bf16 %v2218_v1, %v2218_v1 }
 0x170   :  { %v284_v46 = vsel %vm283_vm3, %v281_v45, -inf }
 0x171   :  { %285 = vmax.xlane.f32.xlu1 %v284_v46  ;;  %v452_v45 = vsel %vm450_vm5, %v2318_v43, 0  ;;  %v2323_v46 = vpack.c.bf16 %v2223_v2, %v2223_v2 }
 0x172   :  { %1738 = vmatpush3.bf16.msra.mxu0 %v452_v45 }
 0x173   :  { %1749 = vmatprep.subr.bf16.mxu0 %v2042_v56  ;;  %v498_v1 = vsel %vm450_vm5, %v2323_v46, 0 }
 0x174   :  { %1744 = vmatpush3.bf16.msra.mxu1 %v498_v1  ;;  %v1870_v1 = vld [vmem:[%s2605_s16] sm:$0xff]  }
 0x175   :  { %1757 = vmatprep.subr.bf16.mxu1 %v2042_v56 }
 0x1fe   :  { %v286_v47 = vpop.xlane.xlu1 %285 }
 0x1ff   :  { %v291_v48 = vrot.slane %v286_v47, %v2277_v27  ;;  %v295_v49 = vrot.slane %v286_v47, %v2274_v26 }
 0x201   :  { %v298_v50 = vsub.f32 %v1885_v39, %v291_v48  ;;  %v299_v51 = vsub.f32 %v1883_v38, %v295_v49 }
 0x203   :  { %v300_v52 = vmul.f32 1.442695, %v298_v50  ;;  %v302_v53 = vmul.f32 1.442695, %v299_v51 }
 0x205   :  { %1886 = vpow2.f32 %v300_v52 }
 0x206   :  { %1888 = vpow2.f32 %v302_v53 }
 0x20f   :  { %v1887_v54 = vpop.eup %1886 }
 0x210   :  { %307 = vperm.xlu0 %1861, %v1887_v54   ;;  %v1889_v55 = vpop.eup %1888 }
 0x214   :  { %310 = vperm.xlu0 %1861, %v1889_v55  }
 0x218   :  { %359 = vperm.xlu0 %1861, %v2233_v4  }
 0x28f   :  { %v308_v57 = vpop.permute.xlu0 %307 }
 0x290   :  { %v315_v59 = vrot.slane %v308_v57, %v2283_v40  ;;  %v1864_v57 = vld [vmem:[%s2647_s9 + $0x8] sm:$0xff]  }
 0x293   :  { %v311_v58 = vpop.permute.xlu0 %310 }
 0x294   :  { %v319_v60 = vrot.slane %v311_v58, %v2283_v40  ;;  %v546_v58 = vld [vmem:[#allocation2] sm:$0x3] }
 0x296   :  { %v320_v61 = vsel %vm280_vm2, %v319_v60, %v315_v59  ;;  %v1865_v59 = vld [vmem:[%s2648_s10 + $0x8] sm:$0xff]   ;;  %v551_v60 = vpack.c.bf16 %v546_v58, %v546_v58 }
 0x297   :  { %v360_v62 = vpop.permute.xlu0 %359  ;;  %v322_v63 = vsel %vm283_vm3, %v320_v61, 0.0  ;;  %v1868_v61 = vld [vmem:[%s2649_s12] sm:$0xff]  }
 0x298   :  { %vm361_vm4 = vcmp.eq.s32.totalorder %v2238_v5, %v360_v62  ;;  %323 = vadd.xlane.f32.xlu1 %v322_v63 }
 0x299   :  { %v1651_v0 = vsel %vm361_vm4, 1.0, %v2042_v56 }
 0x29a   :  { %v368_v6 = vrot.slane %v1651_v0, %v2277_v27  ;;  %v375_v4 = vrot.slane %v1651_v0, %v2274_v26 }
 0x29c   :  { %370 = vbcast.lane.b32.xlu0 %v368_v6, 256 }
 0x2a9   :  { %377 = vbcast.lane.b32.xlu1 %v375_v4, 256 }
 0x30e   :  { %v371_v16 = vpop.permute.xlu0 %370 }
 0x325   :  { %v324_v7 = vpop.xlane.xlu1 %323 }
 0x326   :  { %1890 = vrcp.f32 %v324_v7 }
 0x329   :  { %v378_v19 = vpop.permute.xlu1 %377 }
 0x330   :  { %v1891_v8 = vpop.eup %1890 }
 0x331   :  { %v334_v9 = vrot.slane %v1891_v8, %v2274_v26  ;;  %v330_v12 = vrot.slane %v1891_v8, %v2277_v27 }
 0x333   :  { %v337_v15 = vmul.f32 %v1887_v54, %v330_v12  ;;  %v338_v18 = vmul.f32 %v1889_v55, %v334_v9  ;;  %v1862_v54 = vld [vmem:[%s2647_s9] sm:$0xff]  }
 0x334   :  { %v1863_v55 = vld [vmem:[%s2648_s10] sm:$0xff]   ;;  %s2650_s10 = sld [smem:[#allocation35_spill]] }
 0x335   :  { %342 = vperm.xlu1 %1860, %v337_v15   ;;  %v381_v5 = vmul.f32 %v371_v16, %v337_v15  ;;  %v382_v20 = vmul.f32 %v378_v19, %v338_v18 }
 0x337   :  { %386 = vperm.xlu0 %1861, %v381_v5  }
 0x339   :  { %345 = vperm.xlu1 %1860, %v338_v18  }
 0x33b   :  { %389 = vperm.xlu0 %1861, %v382_v20  }
 0x3b4   :  { %v343_v22 = vpop.permute.xlu1 %342 }
 0x3b5   :  { %v350_v25 = vrot.slane %v343_v22, %v2283_v40 }
 0x3b6   :  { %v387_v23 = vpop.permute.xlu0 %386 }
 0x3b7   :  { %v394_v30 = vrot.slane %v387_v23, %v2283_v40 }
 0x3b8   :  { %v346_v24 = vpop.permute.xlu1 %345 }
 0x3b9   :  { %v354_v28 = vrot.slane %v346_v24, %v2283_v40  ;;  %v1866_v24 = vld [vmem:[%s2602_s13] sm:$0xff]  }
 0x3ba   :  { %v390_v29 = vpop.permute.xlu0 %389 }
 0x3bb   :  { %v355_v31 = vsel %vm280_vm2, %v354_v28, %v350_v25  ;;  %v398_v32 = vrot.slane %v390_v29, %v2283_v40  ;;  %v1867_v29 = vld [vmem:[%s2602_s13 + $0x8] sm:$0xff]  }
 0x3bc   :  { %357 = vst.msk [vmem:[#allocation13] sm:$0x3] %vm283_vm3, %v355_v31 }
 0x3bd   :  { %v399_v33 = vsel %vm280_vm2, %v398_v32, %v394_v30 }
 0x3be   :  { %v401_v34 = vsel %vm283_vm3, %v399_v33, 0.0 }
 0x3bf   :  { %402 = vadd.xlane.f32.xlu0 %v401_v34 }
 0x3c3   :  { %v2312_v35 = vld [vmem:[#allocation13] sm:$0x3] }
 0x44c   :  { %v403_v36 = vpop.xlane.xlu0 %402 }
 0x44d   :  { %v404_v37 = vadd.f32 1e-08, %v403_v36  ;;  %v1869_v36 = vld [vmem:[%s2649_s12 + $0x8] sm:$0xff]  }
 0x44f   :  { %1892 = vrcp.f32 %v404_v37 }
 0x459   :  { %v1893_v38 = vpop.eup %1892 }
 0x45a   :  { %v410_v39 = vrot.slane %v1893_v38, %v2277_v27  ;;  %v414_v42 = vrot.slane %v1893_v38, %v2274_v26  ;;  %v1660_v38 = vld [vmem:[%s2650_s10] ss:$0 sm:$0xff] }
 0x45c   :  { %v417_v41 = vmul.f32 %v410_v39, %v381_v5  ;;  %v418_v44 = vmul.f32 %v414_v42, %v382_v20 }
 0x45e   :  { %424 = vperm.xlu1 %1860, %v417_v41  }
 0x462   :  { %427 = vperm.xlu1 %1860, %v418_v44  }
 0x4dd   :  { %v425_v47 = vpop.permute.xlu1 %424 }
 0x4de   :  { %v432_v48 = vrot.slane %v425_v47, %v2283_v40 }
 0x4e0   :  { %v440_v2 = vsel %vm439_vm7, %v350_v25, %v432_v48 }
 0x4e1   :  { %v442_v49 = vpack.c.bf16 %v440_v2, %v440_v2  ;;  %v428_v50 = vpop.permute.xlu1 %427  ;;  %v1871_v2 = vld [vmem:[%s2605_s16 + $0x8] sm:$0xff]  }
 0x4e2   :  { %v436_v51 = vrot.slane %v428_v50, %v2283_v40 }
 0x4e3   :  { %1740 = vmatmul.mubr.msk.bf16.vlgmr.msra.gmra.mrb[0].mxu0 %vm446_vm8, %v442_v49 }
 0x4e4   :  { %v441_v52 = vsel %vm439_vm7, %v354_v28, %v436_v51  ;;  %1753 = vmatprep.mubr.msk.bf16.mxu0 %vm2043_vm6, %v2042_v56  ;;  %1750 = vmatpush3.bf16.msra.mxu0 %v1863_v55  ;;  %v1874_v55 = vld [vmem:[%s2610_s21] sm:$0xff]  }
 0x4e5   :  { %v443_v53 = vpack.c.bf16 %v441_v52, %v441_v52  ;;  %1751 = vmatprep.subr.bf16.mxu0 %v2042_v56  ;;  %v886_v52 = vpack.c.bf16 %v2228_v3, %v2228_v3 }
 0x4e7   :  { %1746 = vmatmul.mubr.msk.bf16.vlgmr.msra.gmra.mrb[0].mxu1 %vm446_vm8, %v443_v53  ;;  %v1872_v53 = vld [vmem:[%s2608_s19] sm:$0xff]  }
 0x4e8   :  { %1761 = vmatprep.mubr.msk.bf16.mxu1 %vm2043_vm6, %v2042_v56  ;;  %1758 = vmatpush3.bf16.msra.mxu1 %v1862_v54  ;;  %v1873_v54 = vld [vmem:[%s2608_s19 + $0x8] sm:$0xff]  }
 0x4e9   :  { %1759 = vmatprep.subr.bf16.mxu1 %v2042_v56  ;;  %1752 = vmatpush3.bf16.msra.mxu0 %v1865_v59 }
 0x4ea   :  { %1765 = vmatprep.subr.bf16.mxu0 %v2042_v56 }
 0x4ec   :  { %1760 = vmatpush3.bf16.msra.mxu1 %v1864_v57  ;;  %v1875_v57 = vld [vmem:[%s2610_s21 + $0x8] sm:$0xff]   ;;  %s2044_s21 = smov 32  }
 0x4ed   :  { %1773 = vmatprep.subr.bf16.mxu1 %v2042_v56  ;;  %974 = vrot.lane.b32.xlu0 %v2228_v3, %s2044_s21 }
 0x4ef   :  { %1762 = vmatmul.mubr.msk.bf16.vlgmr.msra.gmra.mrb[4].mxu1 %vm216_vm1, %v551_v60  ;;  %v1876_v60 = vld [vmem:[%s2604_s15] sm:$0xff]  }
 0x4f0   :  { %1777 = vmatprep.mubr.msk.bf16.mxu1 %vm2043_vm6, %v2042_v56  ;;  %1774 = vmatpush3.bf16.msra.mxu1 %v1868_v61 }
 0x4f1   :  { %1775 = vmatprep.subr.bf16.mxu1 %v2042_v56 }
 0x4f4   :  { %1776 = vmatpush3.bf16.msra.mxu1 %v1869_v36 }
 0x4f5   :  { %1789 = vmatprep.subr.bf16.mxu1 %v2042_v56 }
 0x5b6   :  { %v488_v62 = vpop.f32.mrb[0].mxu0 }
 0x5b7   :  { %v556_v63 = vpack.c.bf16 %v488_v62, %v488_v62  ;;  %v1741_v0 = vpop.f32.mrb[1].mxu0 }
 0x5b8   :  { %v491_v6 = vpop.f32.mrb[2].mxu0 }
 0x5b9   :  { %v560_v4 = vunpack.c.l.b16 %v556_v63  ;;  %v1742_v7 = vpop.f32.mrb[3].mxu0 }
 0x5ba   :  { %v534_v8 = vpop.f32.mrb[0].mxu1 }
 0x5bb   :  { %v542_v9 = vrot.slane %v534_v8, 7  ;;  %v557_v12 = vpack.c.bf16 %v534_v8, %v534_v8  ;;  %v1747_v15 = vpop.f32.mrb[1].mxu1  ;;  %v562_v18 = vrot.slane %v560_v4, 1 }
 0x5bc   :  { %v537_v16 = vpop.f32.mrb[2].mxu1 }
 0x5bd   :  { %v543_v5 = vsel %vm280_vm2, %v542_v9, %v488_v62  ;;  %v561_v19 = vunpack.c.l.b16 %v557_v12  ;;  %v1748_v20 = vpop.f32.mrb[3].mxu1  ;;  %v1667_v62 = vld [vmem:[%s2603_s14] ss:$0 sm:$0xff]  ;;  %s2045_s14 = smov 64  }
 0x5be   :  { %545 = vst.msk [vmem:[#allocation3] sm:$0x3] %vm231_vm0, %v543_v5  ;;  %v1672_v9 = vld [vmem:[%s2607_s18] ss:$0 sm:$0xff] }
 0x5bf   :  { %v563_v22 = vsel %vm280_vm2, %v561_v19, %v562_v18  ;;  %v693_v23 = vrot.slane %v561_v19, 7  ;;  %v1878_v19 = vld [vmem:[%s2611_s22] sm:$0xff]  }
 0x5c0   :  { %v564_v25 = vpack.c.b16 %v563_v22, %v563_v22 }
 0x5c1   :  { %v694_v28 = vsel %vm280_vm2, %v693_v23, %v560_v4 }
 0x5c2   :  { %1754 = vmatmul.mubr.msk.bf16.vlgmr.msra.gmra.mrb[4].mxu0 %vm216_vm1, %v564_v25  ;;  %v695_v30 = vpack.c.b16 %v694_v28, %v694_v28  ;;  %v669_v31 = vpop.f32.mrb[4].mxu1 }
 0x5c3   :  { %1766 = vmatpush3.bf16.msra.mxu0 %v1866_v24  ;;  %1769 = vmatprep.mubr.msk.bf16.mxu0 %vm2043_vm6, %v2042_v56  ;;  %v1763_v32 = vpop.f32.mrb[5].mxu1  ;;  %v1879_v24 = vld [vmem:[%s2611_s22 + $0x8] sm:$0xff]  }
 0x5c4   :  { %1767 = vmatprep.subr.bf16.mxu0 %v2042_v56  ;;  %v672_v33 = vpop.f32.mrb[6].mxu1 }
 0x5c5   :  { %v1764_v34 = vpop.f32.mrb[7].mxu1  ;;  %v1234_v28 = vld [vmem:[#allocation3] sm:$0x3]  ;;  %v1668_v33 = vld [vmem:[%s2606_s17] ss:$0 sm:$0xff]  ;;  %s2046_s17 = smov 96  }
 0x5c7   :  { %1768 = vmatpush3.bf16.msra.mxu0 %v1867_v29  ;;  %v1245_v29 = vpack.c.bf16 %v1234_v28, %v1234_v28 }
 0x5c8   :  { %1781 = vmatprep.subr.bf16.mxu0 %v2042_v56 }
 0x5ca   :  { %1770 = vmatmul.mubr.msk.bf16.vlgmr.msra.gmra.mrb[8].mxu0 %vm216_vm1, %v695_v30 }
 0x5cb   :  { %1785 = vmatprep.mubr.msk.bf16.mxu0 %vm2043_vm6, %v2042_v56  ;;  %1782 = vmatpush3.bf16.msra.mxu0 %v1876_v60 }
 0x5cc   :  { %1783 = vmatprep.subr.bf16.mxu0 %v2042_v56 }
 0x695   :  { %v614_v37 = vpop.f32.mrb[4].mxu0 }
 0x696   :  { %v670_v39 = vadd.f32 %v669_v31, %v614_v37  ;;  %v1755_v41 = vpop.f32.mrb[5].mxu0 }
 0x697   :  { %v617_v42 = vpop.f32.mrb[6].mxu0 }
 0x698   :  { %v682_v44 = vadd.f32 %v1660_v38, %v670_v39  ;;  %v1756_v45 = vpop.f32.mrb[7].mxu0 }
 0x69a   :  { %683 = vst.msk [vmem:[#allocation4] sm:$0x3] %vm231_vm0, %v682_v44  ;;  %v688_v47 = vpack.c.bf16 %v682_v44, %v682_v44 }
 0x69c   :  { %1778 = vmatmul.mubr.msk.bf16.vlgmr.msra.gmra.mrb[8].mxu1 %vm216_vm1, %v688_v47 }
 0x69d   :  { %v745_v48 = vpop.f32.mrb[8].mxu0  ;;  %1790 = vmatpush3.bf16.msra.mxu1 %v1870_v1  ;;  %1793 = vmatprep.mubr.msk.bf16.mxu1 %vm2043_vm6, %v2042_v56 }
 0x69e   :  { %v1771_v49 = vpop.f32.mrb[9].mxu0  ;;  %1791 = vmatprep.subr.bf16.mxu1 %v2042_v56 }
 0x69f   :  { %v748_v50 = vpop.f32.mrb[10].mxu0 }
 0x6a0   :  { %v1772_v51 = vpop.f32.mrb[11].mxu0 }
 0x6a1   :  { %1792 = vmatpush3.bf16.msra.mxu1 %v1871_v2  ;;  %v1233_v58 = vld [vmem:[#allocation4] sm:$0x3] }
 0x6a2   :  { %1805 = vmatprep.subr.bf16.mxu1 %v2042_v56  ;;  %v1240_v59 = vpack.c.bf16 %v1233_v58, %v1233_v58 }
 0x6a4   :  { %1794 = vmatmul.mubr.msk.bf16.vlgmr.msra.gmra.mrb[12].mxu1 %vm216_vm1, %v886_v52 }
 0x6a5   :  { %1806 = vmatpush3.bf16.msra.mxu1 %v1872_v53  ;;  %1809 = vmatprep.mubr.msk.bf16.mxu1 %vm2043_vm6, %v2042_v56 }
 0x6a6   :  { %1807 = vmatprep.subr.bf16.mxu1 %v2042_v56 }
 0x6a9   :  { %1808 = vmatpush3.bf16.msra.mxu1 %v1873_v54 }
 0x6aa   :  { %1821 = vmatprep.subr.bf16.mxu1 %v2042_v56 }
 0x6ac   :  { %1810 = vmatmul.mubr.msk.bf16.vlgmr.msra.gmra.mrb[16].mxu1 %vm216_vm1, %v2323_v46  ;;  %v1877_v46 = vld [vmem:[%s2604_s15 + $0x8] sm:$0xff]  }
 0x6ad   :  { %1822 = vmatpush3.bf16.msra.mxu1 %v1874_v55  ;;  %1825 = vmatprep.mubr.msk.bf16.mxu1 %vm2043_vm6, %v2042_v56 }
 0x6ae   :  { %1823 = vmatprep.subr.bf16.mxu1 %v2042_v56  ;;  %1784 = vmatpush3.bf16.msra.mxu0 %v1877_v46  ;;  %v1880_v46 = vld [vmem:[%s2612_s23] sm:$0xff]  }
 0x6af   :  { %1797 = vmatprep.subr.bf16.mxu0 %v2042_v56 }
 0x6b1   :  { %1824 = vmatpush3.bf16.msra.mxu1 %v1875_v57 }
 0x6b4   :  { %1826 = vmatmul.mubr.msk.bf16.vlgmr.msra.gmra.mrb[20].mxu1 %vm216_vm1, %v1240_v59 }
 0x76f   :  { %v800_v61 = vpop.f32.mrb[8].mxu1 }
 0x770   :  { %v801_v63 = vadd.f32 %v800_v61, %v745_v48  ;;  %v1779_v0 = vpop.f32.mrb[9].mxu1  ;;  %v2047_v61 = vmov 1966171168  }
 0x771   :  { %v803_v6 = vpop.f32.mrb[10].mxu1  ;;  %v975_v0 = vpop.permute.xlu0 %974 }
 0x772   :  { %v813_v4 = vadd.f32 %v1667_v62, %v801_v63  ;;  %v1780_v7 = vpop.f32.mrb[11].mxu1  ;;  %v1104_v62 = vunpack.c.l.s4 %v2047_v61  ;;  %v1881_v6 = vld [vmem:[%s2612_s23 + $0x8] sm:$0xff]  }
 0x774   :  { %v814_v8 = vmax.f32 %v813_v4, 0.0  ;;  %v1105_v63 = vunpack.c.0.s8 %v1104_v62 }
 0x776   :  { %v819_v12 = vpack.c.bf16 %v814_v8, %v814_v8 }
 0x777   :  { %v943_v15 = vpop.f32.mrb[12].mxu1 }
 0x778   :  { %1786 = vmatmul.mubr.msk.bf16.vlgmr.msra.gmra.mrb[12].mxu0 %vm216_vm1, %v819_v12  ;;  %v944_v3 = vadd.f32 %v1672_v9, %v943_v15  ;;  %v1795_v16 = vpop.f32.mrb[13].mxu1  ;;  %v1108_v9 = vsub.s32 %v1105_v63, %v2246_v10 }
 0x779   :  { %1798 = vmatpush3.bf16.msra.mxu0 %v1872_v53  ;;  %1801 = vmatprep.mubr.msk.bf16.mxu0 %vm2043_vm6, %v2042_v56  ;;  %v946_v18 = vpop.f32.mrb[14].mxu1 }
 0x77a   :  { %1799 = vmatprep.subr.bf16.mxu0 %v2042_v56  ;;  %v1796_v5 = vpop.f32.mrb[15].mxu1  ;;  %957 = vrot.lane.b32.xlu1 %v944_v3, %s2045_s14 }
 0x77d   :  { %1800 = vmatpush3.bf16.msra.mxu0 %v1873_v54 }
 0x77e   :  { %1813 = vmatprep.subr.bf16.mxu0 %v2042_v56 }
 0x77f   :  { %v2449_v20 = vpop.f32.mrb[16].mxu1 }
 0x780   :  { %1802 = vmatmul.mubr.msk.bf16.vlgmr.msra.gmra.mrb[16].mxu0 %vm216_vm1, %v2318_v43  ;;  %v1811_v22 = vpop.f32.mrb[17].mxu1 }
 0x781   :  { %1814 = vmatpush3.bf16.msra.mxu0 %v1878_v19  ;;  %v1088_v23 = vpop.f32.mrb[18].mxu1  ;;  %1817 = vmatprep.mubr.msk.bf16.mxu0 %vm2043_vm6, %v2042_v56  ;;  %v1677_v22 = vld [vmem:[%s2609_s20] ss:$0 sm:$0xff] }
 0x782   :  { %1815 = vmatprep.subr.bf16.mxu0 %v2042_v56  ;;  %v1812_v25 = vpop.f32.mrb[19].mxu1  ;;  %v1086_v10 = vadd.f32 %v1677_v22, %v2449_v20 }
 0x784   :  { %v1683_v25 = vmul.f32 -1.442695, %v1086_v10 }
 0x785   :  { %1816 = vmatpush3.bf16.msra.mxu0 %v1879_v24 }
 0x786   :  { %1829 = vmatprep.subr.bf16.mxu0 %v2042_v56 }
 0x787   :  { %v1351_v30 = vpop.f32.mrb[20].mxu1 }
 0x788   :  { %1818 = vmatmul.mubr.msk.bf16.vlgmr.msra.gmra.mrb[20].mxu0 %vm216_vm1, %v1245_v29  ;;  %v1827_v43 = vpop.f32.mrb[21].mxu1 }
 0x789   :  { %v1354_v31 = vpop.f32.mrb[22].mxu1  ;;  %1833 = vmatprep.mubr.msk.bf16.mxu0 %vm2043_vm6, %v2042_v56  ;;  %1830 = vmatpush3.bf16.msra.mxu0 %v1880_v46 }
 0x78a   :  { %v1828_v32 = vpop.f32.mrb[23].mxu1  ;;  %1831 = vmatprep.subr.bf16.mxu0 %v2042_v56 }
 0x78d   :  { %1832 = vmatpush3.bf16.msra.mxu0 %v1881_v6 }
 0x7ec   :  { %v958_v54 = vpop.permute.xlu1 %957 }
 0x84b   :  { %v876_v34 = vpop.f32.mrb[12].mxu0 }
 0x84c   :  { %v877_v36 = vadd.f32 %v1668_v33, %v876_v34  ;;  %v1787_v37 = vpop.f32.mrb[13].mxu0 }
 0x84d   :  { %v879_v38 = vpop.f32.mrb[14].mxu0 }
 0x84e   :  { %v949_v39 = vadd.f32 %v944_v3, %v877_v36  ;;  %v1788_v41 = vpop.f32.mrb[15].mxu0 }
 0x850   :  { %v1676_v42 = vmul.f32 -1.442695, %v949_v39 }
 0x852   :  { %1894 = vpow2.f32 %v1676_v42 }
 0x853   :  { %v1043_v44 = vpop.f32.mrb[16].mxu0 }
 0x854   :  { %v1803_v45 = vpop.f32.mrb[17].mxu0  ;;  %v1044_v23 = vadd.f32 %v1677_v22, %v1043_v44 }
 0x855   :  { %v1046_v1 = vpop.f32.mrb[18].mxu0 }
 0x856   :  { %v1804_v47 = vpop.f32.mrb[19].mxu0  ;;  %v1682_v24 = vmul.f32 -1.442695, %v1044_v23 }
 0x85b   :  { %v1296_v48 = vpop.f32.mrb[20].mxu0 }
 0x85c   :  { %v1895_v2 = vpop.eup %1894  ;;  %v2466_v49 = vadd.f32 %v1351_v30, %v1296_v48  ;;  %v1819_v50 = vpop.f32.mrb[21].mxu0 }
 0x85d   :  { %v953_v51 = vadd.f32 1.0, %v1895_v2  ;;  %v1299_v52 = vpop.f32.mrb[22].mxu0 }
 0x85e   :  { %v1820_v53 = vpop.f32.mrb[23].mxu0 }
 0x85f   :  { %1896 = vrcp.f32 %v953_v51  ;;  %v1693_v51 = vld [vmem:[%s2613_s24] ss:$0 sm:$0xff]  ;;  %s2511_s24 = smov 0  }
 0x869   :  { %v1897_v55 = vpop.eup %1896 }
 0x86a   :  { %v960_v57 = vmul.f32 %v1897_v55, %v958_v54  ;;  %v967_v4 = vsub.f32 1.0, %v1897_v55  ;;  %v977_v8 = vmul.f32 %v1897_v55, %v975_v0 }
 0x86c   :  { %962 = vrot.lane.b32.xlu1 %v960_v57, %s2045_s14 }
 0x8de   :  { %v963_v58 = vpop.permute.xlu1 %962 }
 0x8df   :  { %v965_v59 = vadd.f32 %v963_v58, %v877_v36 }
 0x8e1   :  { %1898 = vtanh.f32 %v965_v59 }
 0x8e2   :  { %1900 = vpow2.f32 %v1682_v24 }
 0x8e3   :  { %1902 = vpow2.f32 %v1683_v25 }
 0x8eb   :  { %v1899_v60 = vpop.eup %1898 }
 0x8ec   :  { %969 = vrot.lane.b32.xlu1 %v1899_v60, %s2046_s17  ;;  %v1901_v28 = vpop.eup %1900 }
 0x8ed   :  { %v1097_v29 = vadd.f32 1.0, %v1901_v28  ;;  %v1903_v30 = vpop.eup %1902 }
 0x8ee   :  { %v1098_v43 = vadd.f32 1.0, %v1903_v30 }
 0x8ef   :  { %1904 = vrcp.f32 %v1097_v29 }
 0x8f0   :  { %1906 = vrcp.f32 %v1098_v43 }
 0x8f9   :  { %v1905_v32 = vpop.eup %1904 }
 0x8fa   :  { %v1907_v36 = vpop.eup %1906 }
 0x95e   :  { %v970_v7 = vpop.permute.xlu1 %969 }
 0x95f   :  { %v972_v12 = vmul.f32 %v970_v7, %v967_v4 }
 0x961   :  { %v978_v15 = vadd.f32 %v977_v8, %v972_v12 }
 0x963   :  { %v1109_v3 = vrot.slane %v978_v15, %v1108_v9  ;;  %980 = vrot.lane.b32.xlu1 %v978_v15, %s2046_s17 }
 0x965   :  { %v1110_v16 = vcombine.high %v1109_v3, %v1109_v3  ;;  %v1117_v18 = vrot.slane %v1109_v3, %v1108_v9 }
 0x967   :  { %v1128_v56 = vrot.slane %v1117_v18, %v2277_v27  ;;  %v1124_v5 = vrot.slane %v1110_v16, %v1108_v9 }
 0x969   :  { %1133 = vrot.lane.b32.xlu1 %v1128_v56, %s2046_s17  ;;  %v1132_v19 = vrot.slane %v1124_v5, %v2277_v27 }
 0x96d   :  { %1135 = vrot.lane.b32.xlu1 %v1132_v19, %s2046_s17 }
 0x9d5   :  { %v981_v31 = vpop.permute.xlu1 %980 }
 0x9d6   :  { %983 = vst.msk [vmem:[#allocation11] sm:$0x3] %vm231_vm0, %v981_v31 }
 0x9db   :  { %v1134_v33 = vpop.permute.xlu1 %1133 }
 0x9dc   :  { %v1139_v34 = vmul.f32 %v1905_v32, %v1134_v33 }
 0x9dd   :  { %v1235_v37 = vld [vmem:[#allocation11] sm:$0x3] }
 0x9de   :  { %v1141_v20 = vsel %vm216_vm1, %v1139_v34, 0.0  ;;  %v1361_v38 = vpack.c.bf16 %v1235_v37, %v1235_v37 }
 0x9df   :  { %1142 = vadd.xlane.f32.xlu1 %v1141_v20  ;;  %v1136_v39 = vpop.permute.xlu1 %1135 }
 0x9e0   :  { %v1140_v41 = vmul.f32 %v1907_v36, %v1136_v39  ;;  %1834 = vmatmul.mubr.msk.bf16.vlgmr.msra.gmra.mrb[24].mxu0 %vm216_vm1, %v1361_v38 }
 0x9e2   :  { %v1144_v42 = vsel %vm216_vm1, %v1140_v41, 0.0 }
 0x9e3   :  { %1145 = vadd.xlane.f32.xlu0 %v1144_v42 }
 0xa6c   :  { %v1143_v44 = vpop.xlane.xlu1 %1142 }
 0xa6d   :  { %v1152_v1 = vrot.slane %v1143_v44, %v2283_v40 }
 0xa70   :  { %v1146_v45 = vpop.xlane.xlu0 %1145 }
 0xa71   :  { %v1156_v47 = vrot.slane %v1146_v45, %v2283_v40 }
 0xa73   :  { %v1157_v48 = vsel %vm280_vm2, %v1156_v47, %v1152_v1 }
 0xa74   :  { %v1159_v2 = vsel %vm283_vm3, %v1157_v48, -inf }
 0xa75   :  { %1160 = vmax.xlane.f32.xlu1 %v1159_v2 }
 0xab3   :  { %v1411_v50 = vpop.f32.mrb[24].mxu0 }
 0xab4   :  { %v1417_v52 = vadd.f32 %v1411_v50, %v2466_v49  ;;  %v1835_v53 = vpop.f32.mrb[25].mxu0 }
 0xab5   :  { %v1414_v54 = vpop.f32.mrb[26].mxu0 }
 0xab6   :  { %v1425_v55 = vadd.f32 %v1693_v51, %v1417_v52  ;;  %v1836_v57 = vpop.f32.mrb[27].mxu0 }
 0xab8   :  { %v1433_v58 = vrot.slane %v1425_v55, %v1108_v9 }
 0xaba   :  { %v1434_v59 = vcombine.high %v1433_v58, %v1433_v58  ;;  %1694 = vst.sshfl [vmem:[#allocation10] sm:$0x1 pattern:$0x73625140] %v1433_v58 }
 0xabc   :  { %1695 = vst.sshfl [vmem:[#allocation10 + $0x1] sm:$0x1 pattern:$0x73625140] %v1434_v59 }
 0xac1   :  { %v1456_v9 = vld [vmem:[#allocation10] sm:$0x1] }
 0xac2   :  { %v1459_v12 = vsel %vm439_vm7, %v1456_v9, -inf }
 0xac3   :  { %v1457_v7 = vld [vmem:[#allocation10 + $0x1] sm:$0x1] }
 0xac4   :  { %v1462_v8 = vsel %vm439_vm7, %v1457_v7, -inf }
 0xb02   :  { %v1161_v60 = vpop.xlane.xlu1 %1160 }
 0xb03   :  { %v1166_v46 = vrot.slane %v1161_v60, %v2277_v27  ;;  %v1170_v61 = vrot.slane %v1161_v60, %v2274_v26 }
 0xb05   :  { %v1173_v62 = vsub.f32 %v1143_v44, %v1166_v46  ;;  %v1174_v63 = vsub.f32 %v1146_v45, %v1170_v61 }
 0xb07   :  { %v1175_v0 = vmul.f32 1.442695, %v1173_v62  ;;  %v1177_v6 = vmul.f32 1.442695, %v1174_v63 }
 0xb09   :  { %1908 = vpow2.f32 %v1175_v0 }
 0xb0a   :  { %1910 = vpow2.f32 %v1177_v6 }
 0xb13   :  { %v1909_v49 = vpop.eup %1908 }
 0xb14   :  { %v1911_v4 = vpop.eup %1910  ;;  %1182 = vperm.xlu0 %1861, %v1909_v49  }
 0xb15   :  { %1185 = vperm.xlu1 %1860, %v1911_v4  }
 0xb33   :  { %1463 = vmax.xlane.f32.xlu0 %v1462_v8 }
 0xb39   :  { %1460 = vmax.xlane.f32.xlu1 %v1459_v12 }
 0xb93   :  { %v1183_v15 = vpop.permute.xlu0 %1182 }
 0xb94   :  { %v1186_v3 = vpop.permute.xlu1 %1185  ;;  %v1190_v16 = vrot.slane %v1183_v15, %v2283_v40 }
 0xb95   :  { %v1194_v18 = vrot.slane %v1186_v3, %v2283_v40 }
 0xb97   :  { %v1195_v56 = vsel %vm280_vm2, %v1194_v18, %v1190_v16 }
 0xb98   :  { %v1197_v5 = vsel %vm283_vm3, %v1195_v56, 0.0 }
 0xb99   :  { %1198 = vadd.xlane.f32.xlu0 %v1197_v5 }
 0xbc0   :  { %v1464_v19 = vpop.xlane.xlu0 %1463 }
 0xbc1   :  { %v1466_v22 = vsub.f32 %v1457_v7, %v1464_v19 }
 0xbc3   :  { %v1469_v23 = vmul.f32 1.442695, %v1466_v22 }
 0xbc5   :  { %1912 = vpow2.f32 %v1469_v23 }
 0xbc6   :  { %v1461_v10 = vpop.xlane.xlu1 %1460 }
 0xbc7   :  { %v1465_v24 = vsub.f32 %v1456_v9, %v1461_v10 }
 0xbc9   :  { %v1467_v25 = vmul.f32 1.442695, %v1465_v24 }
 0xbcb   :  { %1914 = vpow2.f32 %v1467_v25 }
 0xbcf   :  { %v1913_v28 = vpop.eup %1912 }
 0xbd0   :  { %v1474_v29 = vsel %vm439_vm7, %v1913_v28, 0.0 }
 0xbd1   :  { %1475 = vadd.xlane.f32.xlu0 %v1474_v29 }
 0xbd5   :  { %v1915_v30 = vpop.eup %1914 }
 0xbd6   :  { %v1471_v43 = vsel %vm439_vm7, %v1915_v30, 0.0 }
 0xbd7   :  { %1472 = vadd.xlane.f32.xlu1 %v1471_v43 }
 0xc26   :  { %v1199_v31 = vpop.xlane.xlu0 %1198 }
 0xc27   :  { %1916 = vrcp.f32 %v1199_v31 }
 0xc31   :  { %v1917_v32 = vpop.eup %1916 }
 0xc32   :  { %v1209_v33 = vrot.slane %v1917_v32, %v2274_v26  ;;  %v1205_v34 = vrot.slane %v1917_v32, %v2277_v27 }
 0xc34   :  { %v1213_v36 = vmul.f32 %v1911_v4, %v1209_v33  ;;  %v1212_v37 = vmul.f32 %v1909_v49, %v1205_v34 }
 0xc36   :  { %1220 = vperm.xlu0 %1861, %v1213_v36   ;;  %1217 = vperm.xlu1 %1860, %v1212_v37  }
 0xc5e   :  { %v1476_v20 = vpop.xlane.xlu0 %1475 }
 0xc5f   :  { %1918 = vrcp.f32 %v1476_v20 }
 0xc64   :  { %v1473_v38 = vpop.xlane.xlu1 %1472 }
 0xc65   :  { %1920 = vrcp.f32 %v1473_v38 }
 0xc69   :  { %v1919_v39 = vpop.eup %1918 }
 0xc6a   :  { %v1482_v41 = vmul.f32 %v1919_v39, %v1913_v28 }
 0xc6c   :  { %1484 = vst [vmem:[#allocation10 + $0x1] sm:$0x1] %v1482_v41 }
 0xc6f   :  { %v1921_v42 = vpop.eup %1920 }
 0xc70   :  { %v1481_v44 = vmul.f32 %v1921_v42, %v1915_v30 }
 0xc72   :  { %1483 = vst [vmem:[#allocation10] sm:$0x1] %v1481_v44 }
 0xcb5   :  { %v1218_v45 = vpop.permute.xlu1 %1217  ;;  %v1221_v1 = vpop.permute.xlu0 %1220 }
 0xcb6   :  { %v1225_v47 = vrot.slane %v1218_v45, %v2283_v40  ;;  %v1229_v48 = vrot.slane %v1221_v1, %v2283_v40 }
 0xcb8   :  { %v1230_v2 = vsel %vm280_vm2, %v1229_v48, %v1225_v47 }
 0xcb9   :  { %1232 = vst.msk [vmem:[#allocation14] sm:$0x3] %vm283_vm3, %v1230_v2 }
 0xcba LB: > { %v1501_v50 = vstv %s2038_s24  ;;  %v2048_v46 = vmov 0.0   ;;  %v1529_v63 = vld [vmem:[#allocation10] sm:$0x1]  ;;  %v1530_v0 = vld [vmem:[#allocation10 + $0x1] sm:$0x1]  ;;  %s1500_s24 = sadd.s32 1, %s2038_s24   ;;  %s2038_s24 = sphi %s2511_s24, %s1500_s24  }
 0xcbb   : > { %vm1502_vm9 = vcmp.eq.s32.totalorder %v2248_v11, %v1501_v50  ;;  %p1497_p3 = scmp.ge.s32.totalorder %s1500_s24, 8  }
 0xcbc   : > { %v1508_v51 = vsel %vm1502_vm9, %v1487_v17, 0.0  ;;  %v1503_v40 = vsel %vm1502_vm9, %v2312_v35, 0.0  ;;  %s2049_s5 = smov (%p1497_p3), [#allocation11]   ;;  %s2050_s9 = smov (%p1497_p3), [#allocation10]  }
 0xcbd   : > { %v1509_v52 = vsel %vm283_vm3, %v1508_v51, 0.0  ;;  %v1505_v53 = vsel %vm283_vm3, %v1503_v40, 0.0  ;;  %s1566_s19 = sshll.u32 (%p1497_p3), %s2049_s5, 4  ;;  %s1553_s13 = sshll.u32 (%p1497_p3), %s2050_s9, 4  ;;  %s1567_s19 = int_to_ptr.vmem [resolvable:$true] %s1566_s19  ;;  %s2534_s13 = int_to_ptr.vmem [resolvable:$true] %s1553_s13 }
 0xcbe   : > { %1510 = vadd.xlane.f32.xlu0 %v1509_v52  ;;  %s1932_s30 = scalar_lea.vmem (%p1497_p3), %s1567_s19, 32  ;;  %p1937_p5 = scmp.lt.s32.totalorder (%p1497_p3), %s1567_s19, %s1567_s19 }
 0xcbf   :  { %p1933_p4 = scmp.ne.s32.totalorder (%p1497_p3), %s1567_s19, %s1932_s30  ;;  %p1938_p6 = scmp.lt.s32.totalorder (%p1497_p3), %s1932_s30, %s1932_s30 }
 0xcc1   :  { %p1939_p7 = por (%p1497_p3), %p1938_p6, %p1937_p5 }
 0xcc2   : > { %1506 = vadd.xlane.f32.xlu0 %v1505_v53 }
 0xcc3   :  { %p1940_p8 = pnand (%p1497_p3), %p1939_p7, %p1933_p4 }
 0xd4b   : > { %v1511_v54 = vpop.xlane.xlu0 %1510 }
 0xd4c   : > { %v1516_v55 = vrot.slane %v1511_v54, %v2277_v27  ;;  %v1520_v57 = vrot.slane %v1511_v54, %v2274_v26 }
 0xd4e   : > { %vm1523_vm10 = vcmp.eq.f32.partialorder %v1494_v21, %v1516_v55  ;;  %vm1524_vm11 = vcmp.eq.f32.partialorder %v1494_v21, %v1520_v57 }
 0xd4f   : > { %v1507_v58 = vpop.xlane.xlu0 %1506  ;;  %v1696_v61 = vsel %vm1523_vm10, 1.0, %v2048_v46  ;;  %v1697_v62 = vsel %vm1524_vm11, 1.0, %v2048_v46 }
 0xd50   : > { %v1535_v59 = vrot.slane %v1507_v58, %v2277_v27  ;;  %v1539_v60 = vrot.slane %v1507_v58, %v2274_v26  ;;  %1499 = sbr.rel (!%p1497_p3) target bundleno = 3258 (0xcba), region = 244 }
 0xd52   : > { %v1542_v6 = vmul.f32 %v1696_v61, %v1535_v59  ;;  %v1543_v49 = vmul.f32 %v1697_v62, %v1539_v60 }
 0xd54   : > { %v1544_v4 = vadd.f32 %v1542_v6, %v1529_v63  ;;  %v1545_v7 = vadd.f32 %v1543_v49, %v1530_v0 }
 0xd56   : > { %1546 = vst [vmem:[#allocation10] sm:$0x1] %v1544_v4  ;;  %1547 = vst [vmem:[#allocation10 + $0x1] sm:$0x1] %v1545_v7 }
 0xd57   :  { %1943 = shalt.err (!%p1940_p8)
}
 0xd58   :  { %s1944_s10 = scalar_lea.hbm %s2615_s26, 32 }
 0xd59   :  { %p1945_p9 = scmp.ne.s32.totalorder %s2615_s26, %s1944_s10  ;;  %p1948_p10 = scmp.lt.u32.totalorder %s1944_s10, %s2615_s26 }
 0xd5b   :  { %p1950_p11 = pnand %p1948_p10, %p1945_p9 }
 0xd5d   :  { %1953 = shalt.err (!%p1950_p11)
}
 0xd5e   :  { %1569 = dma.vmem_to_hbm [thread:$0]  %s1567_s19, 32, %s2615_s26, [#allocation12]  }
 0xd5f   :  { %s1954_s29 = scalar_lea.vmem %s2534_s13, 32  ;;  %p1959_p13 = scmp.lt.s32.totalorder %s2534_s13, %s2534_s13 }
 0xd60   :  { %p1955_p12 = scmp.ne.s32.totalorder %s2534_s13, %s1954_s29  ;;  %p1960_p0 = scmp.lt.s32.totalorder %s1954_s29, %s1954_s29 }
 0xd62   :  { %p1961_p1 = por %p1960_p0, %p1959_p13 }
 0xd64   :  { %p1962_p2 = pnand %p1961_p1, %p1955_p12 }
 0xd66   :  { %1965 = shalt.err (!%p1962_p2)
}
 0xd67   :  { %s1966_s17 = scalar_lea.hbm %s2614_s25, 32 }
 0xd68   :  { %p1967_p3 = scmp.ne.s32.totalorder %s2614_s25, %s1966_s17  ;;  %p1970_p4 = scmp.lt.u32.totalorder %s1966_s17, %s2614_s25 }
 0xd6a   :  { %p1972_p5 = pnand %p1970_p4, %p1967_p3 }
 0xd6c   :  { %1975 = shalt.err (!%p1972_p5)
}
 0xd6d   :  { %s2051_s26 = smov 16   ;;  %s2052_s23 = smov 1  }
 0xd6e   :  { %1559 = dma.vmem_to_hbm [thread:$0]  %s2534_s13, 32, %s2614_s25, [#allocation8], %s2051_s26, %s2051_s26, %s2052_s23  }
 0xd6f   :  { %s2053_s1 = smov [#allocation13]   ;;  %s2054_s5 = smov [#allocation14]  }
 0xd70   :  { %s1576_s24 = sshll.u32 %s2053_s1, 4  ;;  %s1586_s19 = sshll.u32 %s2054_s5, 4  ;;  %s1577_s24 = int_to_ptr.vmem [resolvable:$true] %s1576_s24  ;;  %s1587_s19 = int_to_ptr.vmem [resolvable:$true] %s1586_s19 }
 0xd71   :  { %s1976_s9 = scalar_lea.vmem %s1577_s24, 32  ;;  %p1981_p7 = scmp.lt.s32.totalorder %s1577_s24, %s1577_s24 }
 0xd72   :  { %p1977_p6 = scmp.ne.s32.totalorder %s1577_s24, %s1976_s9  ;;  %p1982_p8 = scmp.lt.s32.totalorder %s1976_s9, %s1976_s9 }
 0xd74   :  { %p1983_p9 = por %p1982_p8, %p1981_p7 }
 0xd76   :  { %p1984_p10 = pnand %p1983_p9, %p1977_p6 }
 0xd78   :  { %1987 = shalt.err (!%p1984_p10)
}
 0xd79   :  { %s1988_s3 = scalar_lea.hbm %s2616_s27, 32 }
 0xd7a   :  { %p1989_p11 = scmp.ne.s32.totalorder %s2616_s27, %s1988_s3  ;;  %p1992_p12 = scmp.lt.u32.totalorder %s1988_s3, %s2616_s27 }
 0xd7c   :  { %p1994_p13 = pnand %p1992_p12, %p1989_p11 }
 0xd7e   :  { %1997 = shalt.err (!%p1994_p13)
}
 0xd7f   :  { %1579 = dma.vmem_to_hbm [thread:$0]  %s1577_s24, 32, %s2616_s27, [#allocation12]  }
 0xd80   :  { %s1998_s15 = scalar_lea.vmem %s1587_s19, 32  ;;  %p2003_p1 = scmp.lt.s32.totalorder %s1587_s19, %s1587_s19 }
 0xd81   :  { %p1999_p0 = scmp.ne.s32.totalorder %s1587_s19, %s1998_s15  ;;  %p2004_p2 = scmp.lt.s32.totalorder %s1998_s15, %s1998_s15 }
 0xd83   :  { %p2005_p3 = por %p2004_p2, %p2003_p1 }
 0xd85   :  { %p2006_p4 = pnand %p2005_p3, %p1999_p0 }
 0xd87   :  { %2009 = shalt.err (!%p2006_p4)
}
 0xd88   :  { %s2010_s29 = scalar_lea.hbm %s2617_s28, 32 }
 0xd89   :  { %p2011_p5 = scmp.ne.s32.totalorder %s2617_s28, %s2010_s29  ;;  %p2014_p6 = scmp.lt.u32.totalorder %s2010_s29, %s2617_s28 }
 0xd8b   :  { %p2016_p7 = pnand %p2014_p6, %p2011_p5 }
 0xd8d   :  { %2019 = shalt.err (!%p2016_p7)
}
 0xd8e   :  { %1589 = dma.vmem_to_hbm [thread:$0]  %s1587_s19, 32, %s2617_s28, [#allocation15]  }
 0xd8f   :  { %2030 = dma.done.wait [#allocation8], 32  }
 0xd90   :  { %2031 = vsyncadd [#allocation8], 4294967264 }
 0xd91   :  { %2032 = dma.done.wait [#allocation12], 64  }
 0xd92   :  { %2033 = vsyncadd [#allocation12], 4294967232 }
 0xd93   :  { %2034 = dma.done.wait [#allocation15], 32  }
 0xd94   :  { %2035 = vsyncadd [#allocation15], 4294967264 }
 0xd95   :  { %1602 = vsyncpa [#allocation8], 1 }
 0xd96   :  { %1603 = vsyncpa [#allocation12], 1 }
 0xd97   :  { %1604 = vsyncpa [#allocation15], 1 }
 0xd98   :  { %1605 = vsyncpa [#allocation9], 1 }
 0xd99   :  { %1606 = vsyncmov [#allocation5] }
 0xd9c   :  { %s1607_s12 = vpop.sfrf %1606 }
 0xd9d   :  { %p1698_p8 = scmp.ne.s32.totalorder %s1607_s12, 0 }
 0xd9f   :  { %1611 = shalt.err (%p1698_p8)  }
 0xda0   :  { %1613 = vsyncmov [#allocation5 + $0x1] }
 0xda3   :  { %s1614_s4 = vpop.sfrf %1613 }
 0xda4   :  { %p1699_p9 = scmp.ne.s32.totalorder %s1614_s4, 0 }
 0xda6   :  { %1618 = shalt.err (%p1699_p9)  }

</bundles_post_ra>
